<compile_context>
chip_gen: v7x
topology: tpu7x:2x2x1
jax: 0.10.0
libtpu: 0.0.40
codegen_flags: <defaults>
</compile_context>

<pallas_src>
import jax
import jax.numpy as jnp
from jax.experimental import pallas as pl
from jax.experimental.pallas import tpu as pltpu


LOGICAL_CH = (64, 96, 176, 216, 216)    # num_ch_enc of DepthNet
PADDED_CH = (128, 128, 256, 256, 256)   # lane-dense (multiple-of-128) widths
IN_CH = 3
IN_CH_PAD = 8                           # stage-1 Cin padded: K = 9*8 = 72


def _round_up(x, m):
    return (x + m - 1) // m * m


def _hw_config():
    """Return (preferred N tile, vmem_limit_bytes) for the local TPU gen."""
    try:
        kind = jax.devices()[0].device_kind.lower()
    except Exception:
        kind = ""
    if "v5" in kind:                     # v5e/v5p: 128-wide MXU, 128 MiB VMEM
        return 128, 100 * 1024 * 1024    # raise above the 16 MiB scoped default
    if "7" in kind:                      # v7x: 64 MiB physical VMEM
        return 256, 48 * 1024 * 1024
    return 256, 64 * 1024 * 1024         # v6e default


def _pick_tk(k_pad, cap=512):
    """Largest multiple of 128 that divides k_pad and is <= cap."""
    best = 128
    t = 128
    while t <= min(k_pad, cap):
        if k_pad % t == 0:
            best = t
        t += 128
    return best


# ---------------------------------------------------------------------------
# Pallas kernel: tiled matmul + bias + ReLU with f32 VMEM accumulator
# ---------------------------------------------------------------------------

def _matmul_bias_relu_kernel(a_ref, w_ref, b_ref, o_ref, acc_ref):
    k = pl.program_id(2)

    @pl.when(k == 0)
    def _init():
        acc_ref[...] = jnp.zeros_like(acc_ref)

    acc_ref[...] += jnp.dot(a_ref[...], w_ref[...],
                            preferred_element_type=jnp.float32)

    @pl.when(k == pl.num_programs(2) - 1)
    def _finalize():
        out = acc_ref[...] + b_ref[...]            # bias add in f32
        o_ref[...] = jnp.maximum(out, 0.0).astype(o_ref.dtype)


def matmul_bias_relu(a, wmat, bias, out_dtype=jnp.bfloat16):
    """ReLU((M,K)@(K,Cout) + bias). a/wmat bf16, bias f32 of shape (1, Cout)."""
    M, K = a.shape
    Kw, Cout = wmat.shape
    assert K == Kw and Cout % 128 == 0

    tn_pref, vmem_limit = _hw_config()
    tn = tn_pref if Cout % tn_pref == 0 else 128

    tm = min(512, _round_up(M, 8))
    m_pad = _round_up(M, tm)
    k_pad = _round_up(K, 128)
    tk = _pick_tk(k_pad)

    if m_pad != M or k_pad != K:
        a = jnp.pad(a, ((0, m_pad - M), (0, k_pad - K)))
    if k_pad != K:
        wmat = jnp.pad(wmat, ((0, k_pad - K), (0, 0)))

    grid = (m_pad // tm, Cout // tn, k_pad // tk)

    out = pl.pallas_call(
        _matmul_bias_relu_kernel,
        out_shape=jax.ShapeDtypeStruct((m_pad, Cout), out_dtype),
        grid_spec=pltpu.PrefetchScalarGridSpec(
            num_scalar_prefetch=0,
            grid=grid,
            in_specs=[
                pl.BlockSpec((tm, tk), lambda i, j, k: (i, k)),
                pl.BlockSpec((tk, tn), lambda i, j, k: (k, j)),
                pl.BlockSpec((1, tn), lambda i, j, k: (0, j)),
            ],
            out_specs=pl.BlockSpec((tm, tn), lambda i, j, k: (i, j)),
            scratch_shapes=[pltpu.VMEM((tm, tn), jnp.float32)],
        ),
        compiler_params=pltpu.CompilerParams(
            dimension_semantics=("parallel", "parallel", "arbitrary"),
            vmem_limit_bytes=vmem_limit,
        ),
    )(a, wmat, bias)

    return out[:M]


# ---------------------------------------------------------------------------
# Encoder stage: 3x3 stride-2 conv (pad=1) + bias + ReLU
#   (patch extraction in XLA glue, matmul+bias+ReLU on the MXU via Pallas)
# ---------------------------------------------------------------------------

def conv3x3_s2_relu(x_nhwc, wmat, bias, pad_value=0.0):
    N, H, W, C = x_nhwc.shape
    xp = jnp.pad(x_nhwc, ((0, 0), (1, 1), (1, 1), (0, 0)),
                 constant_values=jnp.asarray(pad_value, x_nhwc.dtype))
    Ho = (H + 2 - 3) // 2 + 1
    Wo = (W + 2 - 3) // 2 + 1
    cols = []
    for dh in range(3):
        for dw in range(3):
            cols.append(xp[:, dh:dh + 2 * Ho:2, dw:dw + 2 * Wo:2, :])
    # (dh, dw, cin) ordering matches w.reshape(9*Cin, Cout)
    patches = jnp.concatenate(cols, axis=-1)            # (N, Ho, Wo, 9*C) bf16
    a = patches.reshape(N * Ho * Wo, 9 * C)
    out = matmul_bias_relu(a, wmat, bias)                # (M, Cout_pad) bf16
    return out.reshape(N, Ho, Wo, -1)


# ---------------------------------------------------------------------------
# DepthNet parameters and forward
# ---------------------------------------------------------------------------

def init_params(key):
    """Per stage: (wmat bf16 of shape (9*Cin_pad, Cout_pad), bias f32 (1, Cout_pad)).

    Stage-1 weights fold the (x-0.45)/0.225 normalization; padded channel
    rows/cols are zero so padded activations stay exactly zero through ReLU.
    """
    params = []
    c_prev, c_prev_pad = IN_CH, IN_CH_PAD
    for idx, (c_out, c_out_pad) in enumerate(zip(LOGICAL_CH, PADDED_CH)):
        key, kw = jax.random.split(key)
        fan_in = 9 * c_prev
        w = jax.random.normal(kw, (3, 3, c_prev, c_out), jnp.float32) * jnp.sqrt(
            2.0 / fan_in)
        b = jnp.zeros((c_out,), jnp.float32)
        if idx == 0:
            # Fold normalization into the first conv.
            b = b - (0.45 / 0.225) * jnp.sum(w, axis=(0, 1, 2))
            w = w / 0.225
        w_pad = jnp.zeros((3, 3, c_prev_pad, c_out_pad), jnp.float32)
        w_pad = w_pad.at[:, :, :c_prev, :c_out].set(w)
        b_pad = jnp.zeros((c_out_pad,), jnp.float32).at[:c_out].set(b)
        wmat = w_pad.reshape(9 * c_prev_pad, c_out_pad).astype(jnp.bfloat16)
        params.append((wmat, b_pad.reshape(1, c_out_pad)))
        c_prev, c_prev_pad = c_out, c_out_pad
    return params


def depthnet_forward(input_image_nchw, params):
    """Mirrors DepthNet.forward: x = (img - 0.45)/0.225 (folded into stage 1),
    then the encoder; returns 5 multi-scale NCHW f32 features with channels
    [64, 96, 176, 216, 216]."""
    N, C, H, W = input_image_nchw.shape

    # NHWC, bf16, pad input channels 3 -> 8 (padded channels have zero weight).
    x = jnp.transpose(input_image_nchw, (0, 2, 3, 1)).astype(jnp.bfloat16)
    x = jnp.pad(x, ((0, 0), (0, 0), (0, 0), (0, IN_CH_PAD - C)))

    # Stage-1 spatial border uses raw 0.45 == 0 in normalized space (since
    # normalization is folded into the stage-1 weights); later stages pad 0.
    pad_vals = (0.45, 0.0, 0.0, 0.0, 0.0)

    feats_nhwc = []
    for (wmat, b), pv in zip(params, pad_vals):
        x = conv3x3_s2_relu(x, wmat, b, pad_value=pv)
        feats_nhwc.append(x)

    # Single conversion at the end: slice padded channels, NCHW, f32.
    features = []
    for f, c in zip(feats_nhwc, LOGICAL_CH):
        features.append(jnp.transpose(f[..., :c], (0, 3, 1, 2)).astype(jnp.float32))
    return features


if __name__ == "__main__":
    key = jax.random.PRNGKey(0)
    k_x, k_p = jax.random.split(key)

    # Small image consistent with an image encoder: batch=2, 3 channels, 32x32.
    x = jax.random.uniform(k_x, (2, 3, 32, 32), dtype=jnp.float32)
    params = init_params(k_p)

    fwd = jax.jit(depthnet_forward)
    feats = fwd(x, params)
    feats = jax.block_until_ready(feats)

    strides = (2, 4, 8, 16, 32)
    for f, c, s in zip(feats, LOGICAL_CH, strides):
        assert f.shape == (2, c, 32 // s, 32 // s), f.shape
        assert f.dtype == jnp.float32
        assert bool(jnp.all(jnp.isfinite(f)))

    print("KERNEL_OK")
</pallas_src>

<mosaic_0001>
module attributes {stable_mosaic.version = 11 : i64} {
  func.func @_matmul_bias_relu_kernel(%arg0: i32, %arg1: i32, %arg2: i32, %arg3: memref<512x128xbf16, #tpu.memory_space<vmem>>, %arg4: memref<128x128xbf16, #tpu.memory_space<vmem>>, %arg5: memref<1x128xf32, #tpu.memory_space<vmem>>, %arg6: memref<512x128xbf16, #tpu.memory_space<vmem>>, %arg7: memref<512x128xf32, #tpu.memory_space<vmem>>) attributes {dimension_semantics = [#tpu.dimension_semantics<parallel>, #tpu.dimension_semantics<parallel>, #tpu.dimension_semantics<arbitrary>], iteration_bounds = array<i64: 1, 1, 1>, scalar_prefetch = 0 : i64, scratch_operands = 1 : i64, tpu.core_type = #tpu.core_type<tc>, window_params = [{transform_indices = @transform_0, window_bounds = array<i64: 512, 128>}, {transform_indices = @transform_1, window_bounds = array<i64: 128, 128>}, {transform_indices = @transform_2, window_bounds = array<i64: 1, 128>}, {transform_indices = @transform_3, window_bounds = array<i64: 512, 128>}]} {
    %c0_i32 = arith.constant 0 : i32
    %0 = arith.cmpi eq, %arg2, %c0_i32 : i32
    %1 = arith.extui %0 : i1 to i32
    %c0_i32_0 = arith.constant 0 : i32
    %2 = arith.cmpi ne, %1, %c0_i32_0 : i32
    scf.if %2 {
      %cst_10 = arith.constant 0.000000e+00 : f32
      %12 = vector.broadcast %cst_10 : f32 to vector<512x128xf32>
      %c0_11 = arith.constant 0 : index
      %c0_12 = arith.constant 0 : index
      %13 = vector.load %arg7[%c0_11, %c0_12] : memref<512x128xf32, #tpu.memory_space<vmem>>, vector<512x128xf32>
      tpu.vector_store %arg7[%c0_11, %c0_12], %12 {strides = array<i32>} : memref<512x128xf32, #tpu.memory_space<vmem>>, vector<512x128xf32>,
    } else {
    }
    %c0 = arith.constant 0 : index
    %c0_1 = arith.constant 0 : index
    %3 = vector.load %arg7[%c0, %c0_1] : memref<512x128xf32, #tpu.memory_space<vmem>>, vector<512x128xf32>
    %c0_2 = arith.constant 0 : index
    %c0_3 = arith.constant 0 : index
    %4 = vector.load %arg3[%c0_2, %c0_3] : memref<512x128xbf16, #tpu.memory_space<vmem>>, vector<512x128xbf16>
    %c0_4 = arith.constant 0 : index
    %c0_5 = arith.constant 0 : index
    %5 = vector.load %arg4[%c0_4, %c0_5] : memref<128x128xbf16, #tpu.memory_space<vmem>>, vector<128x128xbf16>
    %cst = arith.constant dense<0.000000e+00> : vector<512x128xf32>
    %6 = tpu.matmul %4, %5, %cst {dimension_numbers = #tpu.dot_dimension_numbers<[1], [0], [0], [1], [0, 0, 1, 1], [], []>} : vector<512x128xbf16>, vector<128x128xbf16>, vector<512x128xf32> -> vector<512x128xf32>
    %7 = arith.addf %3, %6 : vector<512x128xf32>
    %c0_6 = arith.constant 0 : index
    %c0_7 = arith.constant 0 : index
    %8 = vector.load %arg7[%c0_6, %c0_7] : memref<512x128xf32, #tpu.memory_space<vmem>>, vector<512x128xf32>
    tpu.vector_store %arg7[%c0_6, %c0_7], %7 {strides = array<i32>} : memref<512x128xf32, #tpu.memory_space<vmem>>, vector<512x128xf32>,
    %c0_i32_8 = arith.constant 0 : i32
    %9 = arith.cmpi eq, %arg2, %c0_i32_8 : i32
    %10 = arith.extui %9 : i1 to i32
    %c0_i32_9 = arith.constant 0 : i32
    %11 = arith.cmpi ne, %10, %c0_i32_9 : i32
    scf.if %11 {
      %c0_10 = arith.constant 0 : index
      %c0_11 = arith.constant 0 : index
      %12 = vector.load %arg7[%c0_10, %c0_11] : memref<512x128xf32, #tpu.memory_space<vmem>>, vector<512x128xf32>
      %c0_12 = arith.constant 0 : index
      %c0_13 = arith.constant 0 : index
      %13 = vector.load %arg5[%c0_12, %c0_13] : memref<1x128xf32, #tpu.memory_space<vmem>>, vector<1x128xf32>
      %14 = vector.broadcast %13 : vector<1x128xf32> to vector<512x128xf32>
      %15 = arith.addf %12, %14 : vector<512x128xf32>
      %cst_14 = arith.constant 0.000000e+00 : f32
      %16 = vector.broadcast %cst_14 : f32 to vector<512x128xf32>
      %17 = arith.maximumf %15, %16 : vector<512x128xf32>
      %18 = arith.truncf %17 : vector<512x128xf32> to vector<512x128xbf16>
      %c0_15 = arith.constant 0 : index
      %c0_16 = arith.constant 0 : index
      %19 = vector.load %arg6[%c0_15, %c0_16] : memref<512x128xbf16, #tpu.memory_space<vmem>>, vector<512x128xbf16>
      tpu.vector_store %arg6[%c0_15, %c0_16], %18 {strides = array<i32>} : memref<512x128xbf16, #tpu.memory_space<vmem>>, vector<512x128xbf16>,
    } else {
    }
    return
  }
  func.func @transform_0(%arg0: i32, %arg1: i32, %arg2: i32) -> (i32, i32) {
    %c0_i32 = arith.constant 0 : i32
    return %arg0, %arg2 : i32, i32
  }
  func.func @transform_1(%arg0: i32, %arg1: i32, %arg2: i32) -> (i32, i32) {
    %c0_i32 = arith.constant 0 : i32
    return %arg2, %arg1 : i32, i32
  }
  func.func @transform_2(%arg0: i32, %arg1: i32, %arg2: i32) -> (i32, i32) {
    %c0_i32 = arith.constant 0 : i32
    %c0_i32_0 = arith.constant 0 : i32
    return %c0_i32, %arg1 : i32, i32
  }
  func.func @transform_3(%arg0: i32, %arg1: i32, %arg2: i32) -> (i32, i32) {
    %c0_i32 = arith.constant 0 : i32
    return %arg0, %arg1 : i32, i32
  }
}

module attributes {stable_mosaic.version = 11 : i64} {
  func.func @_matmul_bias_relu_kernel(%arg0: i32, %arg1: i32, %arg2: i32, %arg3: memref<128x384xbf16, #tpu.memory_space<vmem>>, %arg4: memref<384x128xbf16, #tpu.memory_space<vmem>>, %arg5: memref<1x128xf32, #tpu.memory_space<vmem>>, %arg6: memref<128x128xbf16, #tpu.memory_space<vmem>>, %arg7: memref<128x128xf32, #tpu.memory_space<vmem>>) attributes {dimension_semantics = [#tpu.dimension_semantics<parallel>, #tpu.dimension_semantics<parallel>, #tpu.dimension_semantics<arbitrary>], iteration_bounds = array<i64: 1, 1, 3>, scalar_prefetch = 0 : i64, scratch_operands = 1 : i64, tpu.core_type = #tpu.core_type<tc>, window_params = [{transform_indices = @transform_0, window_bounds = array<i64: 128, 384>}, {transform_indices = @transform_1, window_bounds = array<i64: 384, 128>}, {transform_indices = @transform_2, window_bounds = array<i64: 1, 128>}, {transform_indices = @transform_3, window_bounds = array<i64: 128, 128>}]} {
    %c0_i32 = arith.constant 0 : i32
    %0 = arith.cmpi eq, %arg2, %c0_i32 : i32
    %1 = arith.extui %0 : i1 to i32
    %c0_i32_0 = arith.constant 0 : i32
    %2 = arith.cmpi ne, %1, %c0_i32_0 : i32
    scf.if %2 {
      %cst_9 = arith.constant 0.000000e+00 : f32
      %12 = vector.broadcast %cst_9 : f32 to vector<128x128xf32>
      %c0_10 = arith.constant 0 : index
      %c0_11 = arith.constant 0 : index
      %13 = vector.load %arg7[%c0_10, %c0_11] : memref<128x128xf32, #tpu.memory_space<vmem>>, vector<128x128xf32>
      tpu.vector_store %arg7[%c0_10, %c0_11], %12 {strides = array<i32>} : memref<128x128xf32, #tpu.memory_space<vmem>>, vector<128x128xf32>,
    } else {
    }
    %c0 = arith.constant 0 : index
    %c0_1 = arith.constant 0 : index
    %3 = vector.load %arg7[%c0, %c0_1] : memref<128x128xf32, #tpu.memory_space<vmem>>, vector<128x128xf32>
    %c0_2 = arith.constant 0 : index
    %c0_3 = arith.constant 0 : index
    %4 = vector.load %arg3[%c0_2, %c0_3] : memref<128x384xbf16, #tpu.memory_space<vmem>>, vector<128x384xbf16>
    %c0_4 = arith.constant 0 : index
    %c0_5 = arith.constant 0 : index
    %5 = vector.load %arg4[%c0_4, %c0_5] : memref<384x128xbf16, #tpu.memory_space<vmem>>, vector<384x128xbf16>
    %cst = arith.constant dense<0.000000e+00> : vector<128x128xf32>
    %6 = tpu.matmul %4, %5, %cst {dimension_numbers = #tpu.dot_dimension_numbers<[1], [0], [0], [1], [0, 0, 1, 1], [], []>} : vector<128x384xbf16>, vector<384x128xbf16>, vector<128x128xf32> -> vector<128x128xf32>
    %7 = arith.addf %3, %6 : vector<128x128xf32>
    %c0_6 = arith.constant 0 : index
    %c0_7 = arith.constant 0 : index
    %8 = vector.load %arg7[%c0_6, %c0_7] : memref<128x128xf32, #tpu.memory_space<vmem>>, vector<128x128xf32>
    tpu.vector_store %arg7[%c0_6, %c0_7], %7 {strides = array<i32>} : memref<128x128xf32, #tpu.memory_space<vmem>>, vector<128x128xf32>,
    %c2_i32 = arith.constant 2 : i32
    %9 = arith.cmpi eq, %arg2, %c2_i32 : i32
    %10 = arith.extui %9 : i1 to i32
    %c0_i32_8 = arith.constant 0 : i32
    %11 = arith.cmpi ne, %10, %c0_i32_8 : i32
    scf.if %11 {
      %c0_9 = arith.constant 0 : index
      %c0_10 = arith.constant 0 : index
      %12 = vector.load %arg7[%c0_9, %c0_10] : memref<128x128xf32, #tpu.memory_space<vmem>>, vector<128x128xf32>
      %c0_11 = arith.constant 0 : index
      %c0_12 = arith.constant 0 : index
      %13 = vector.load %arg5[%c0_11, %c0_12] : memref<1x128xf32, #tpu.memory_space<vmem>>, vector<1x128xf32>
      %14 = vector.broadcast %13 : vector<1x128xf32> to vector<128x128xf32>
      %15 = arith.addf %12, %14 : vector<128x128xf32>
      %cst_13 = arith.constant 0.000000e+00 : f32
      %16 = vector.broadcast %cst_13 : f32 to vector<128x128xf32>
      %17 = arith.maximumf %15, %16 : vector<128x128xf32>
      %18 = arith.truncf %17 : vector<128x128xf32> to vector<128x128xbf16>
      %c0_14 = arith.constant 0 : index
      %c0_15 = arith.constant 0 : index
      %19 = vector.load %arg6[%c0_14, %c0_15] : memref<128x128xbf16, #tpu.memory_space<vmem>>, vector<128x128xbf16>
      tpu.vector_store %arg6[%c0_14, %c0_15], %18 {strides = array<i32>} : memref<128x128xbf16, #tpu.memory_space<vmem>>, vector<128x128xbf16>,
    } else {
    }
    return
  }
  func.func @transform_0(%arg0: i32, %arg1: i32, %arg2: i32) -> (i32, i32) {
    %c0_i32 = arith.constant 0 : i32
    return %arg0, %arg2 : i32, i32
  }
  func.func @transform_1(%arg0: i32, %arg1: i32, %arg2: i32) -> (i32, i32) {
    %c0_i32 = arith.constant 0 : i32
    return %arg2, %arg1 : i32, i32
  }
  func.func @transform_2(%arg0: i32, %arg1: i32, %arg2: i32) -> (i32, i32) {
    %c0_i32 = arith.constant 0 : i32
    %c0_i32_0 = arith.constant 0 : i32
    return %c0_i32, %arg1 : i32, i32
  }
  func.func @transform_3(%arg0: i32, %arg1: i32, %arg2: i32) -> (i32, i32) {
    %c0_i32 = arith.constant 0 : i32
    return %arg0, %arg1 : i32, i32
  }
}

module attributes {stable_mosaic.version = 11 : i64} {
  func.func @_matmul_bias_relu_kernel(%arg0: i32, %arg1: i32, %arg2: i32, %arg3: memref<32x384xbf16, #tpu.memory_space<vmem>>, %arg4: memref<384x256xbf16, #tpu.memory_space<vmem>>, %arg5: memref<1x256xf32, #tpu.memory_space<vmem>>, %arg6: memref<32x256xbf16, #tpu.memory_space<vmem>>, %arg7: memref<32x256xf32, #tpu.memory_space<vmem>>) attributes {dimension_semantics = [#tpu.dimension_semantics<parallel>, #tpu.dimension_semantics<parallel>, #tpu.dimension_semantics<arbitrary>], iteration_bounds = array<i64: 1, 1, 3>, scalar_prefetch = 0 : i64, scratch_operands = 1 : i64, tpu.core_type = #tpu.core_type<tc>, window_params = [{transform_indices = @transform_0, window_bounds = array<i64: 32, 384>}, {transform_indices = @transform_1, window_bounds = array<i64: 384, 256>}, {transform_indices = @transform_2, window_bounds = array<i64: 1, 256>}, {transform_indices = @transform_3, window_bounds = array<i64: 32, 256>}]} {
    %c0_i32 = arith.constant 0 : i32
    %0 = arith.cmpi eq, %arg2, %c0_i32 : i32
    %1 = arith.extui %0 : i1 to i32
    %c0_i32_0 = arith.constant 0 : i32
    %2 = arith.cmpi ne, %1, %c0_i32_0 : i32
    scf.if %2 {
      %cst_9 = arith.constant 0.000000e+00 : f32
      %12 = vector.broadcast %cst_9 : f32 to vector<32x256xf32>
      %c0_10 = arith.constant 0 : index
      %c0_11 = arith.constant 0 : index
      %13 = vector.load %arg7[%c0_10, %c0_11] : memref<32x256xf32, #tpu.memory_space<vmem>>, vector<32x256xf32>
      tpu.vector_store %arg7[%c0_10, %c0_11], %12 {strides = array<i32>} : memref<32x256xf32, #tpu.memory_space<vmem>>, vector<32x256xf32>,
    } else {
    }
    %c0 = arith.constant 0 : index
    %c0_1 = arith.constant 0 : index
    %3 = vector.load %arg7[%c0, %c0_1] : memref<32x256xf32, #tpu.memory_space<vmem>>, vector<32x256xf32>
    %c0_2 = arith.constant 0 : index
    %c0_3 = arith.constant 0 : index
    %4 = vector.load %arg3[%c0_2, %c0_3] : memref<32x384xbf16, #tpu.memory_space<vmem>>, vector<32x384xbf16>
    %c0_4 = arith.constant 0 : index
    %c0_5 = arith.constant 0 : index
    %5 = vector.load %arg4[%c0_4, %c0_5] : memref<384x256xbf16, #tpu.memory_space<vmem>>, vector<384x256xbf16>
    %cst = arith.constant dense<0.000000e+00> : vector<32x256xf32>
    %6 = tpu.matmul %4, %5, %cst {dimension_numbers = #tpu.dot_dimension_numbers<[1], [0], [0], [1], [0, 0, 1, 1], [], []>} : vector<32x384xbf16>, vector<384x256xbf16>, vector<32x256xf32> -> vector<32x256xf32>
    %7 = arith.addf %3, %6 : vector<32x256xf32>
    %c0_6 = arith.constant 0 : index
    %c0_7 = arith.constant 0 : index
    %8 = vector.load %arg7[%c0_6, %c0_7] : memref<32x256xf32, #tpu.memory_space<vmem>>, vector<32x256xf32>
    tpu.vector_store %arg7[%c0_6, %c0_7], %7 {strides = array<i32>} : memref<32x256xf32, #tpu.memory_space<vmem>>, vector<32x256xf32>,
    %c2_i32 = arith.constant 2 : i32
    %9 = arith.cmpi eq, %arg2, %c2_i32 : i32
    %10 = arith.extui %9 : i1 to i32
    %c0_i32_8 = arith.constant 0 : i32
    %11 = arith.cmpi ne, %10, %c0_i32_8 : i32
    scf.if %11 {
      %c0_9 = arith.constant 0 : index
      %c0_10 = arith.constant 0 : index
      %12 = vector.load %arg7[%c0_9, %c0_10] : memref<32x256xf32, #tpu.memory_space<vmem>>, vector<32x256xf32>
      %c0_11 = arith.constant 0 : index
      %c0_12 = arith.constant 0 : index
      %13 = vector.load %arg5[%c0_11, %c0_12] : memref<1x256xf32, #tpu.memory_space<vmem>>, vector<1x256xf32>
      %14 = vector.broadcast %13 : vector<1x256xf32> to vector<32x256xf32>
      %15 = arith.addf %12, %14 : vector<32x256xf32>
      %cst_13 = arith.constant 0.000000e+00 : f32
      %16 = vector.broadcast %cst_13 : f32 to vector<32x256xf32>
      %17 = arith.maximumf %15, %16 : vector<32x256xf32>
      %18 = arith.truncf %17 : vector<32x256xf32> to vector<32x256xbf16>
      %c0_14 = arith.constant 0 : index
      %c0_15 = arith.constant 0 : index
      %19 = vector.load %arg6[%c0_14, %c0_15] : memref<32x256xbf16, #tpu.memory_space<vmem>>, vector<32x256xbf16>
      tpu.vector_store %arg6[%c0_14, %c0_15], %18 {strides = array<i32>} : memref<32x256xbf16, #tpu.memory_space<vmem>>, vector<32x256xbf16>,
    } else {
    }
    return
  }
  func.func @transform_0(%arg0: i32, %arg1: i32, %arg2: i32) -> (i32, i32) {
    %c0_i32 = arith.constant 0 : i32
    return %arg0, %arg2 : i32, i32
  }
  func.func @transform_1(%arg0: i32, %arg1: i32, %arg2: i32) -> (i32, i32) {
    %c0_i32 = arith.constant 0 : i32
    return %arg2, %arg1 : i32, i32
  }
  func.func @transform_2(%arg0: i32, %arg1: i32, %arg2: i32) -> (i32, i32) {
    %c0_i32 = arith.constant 0 : i32
    %c0_i32_0 = arith.constant 0 : i32
    return %c0_i32, %arg1 : i32, i32
  }
  func.func @transform_3(%arg0: i32, %arg1: i32, %arg2: i32) -> (i32, i32) {
    %c0_i32 = arith.constant 0 : i32
    return %arg0, %arg1 : i32, i32
  }
}

module attributes {stable_mosaic.version = 11 : i64} {
  func.func @_matmul_bias_relu_kernel(%arg0: i32, %arg1: i32, %arg2: i32, %arg3: memref<8x384xbf16, #tpu.memory_space<vmem>>, %arg4: memref<384x256xbf16, #tpu.memory_space<vmem>>, %arg5: memref<1x256xf32, #tpu.memory_space<vmem>>, %arg6: memref<8x256xbf16, #tpu.memory_space<vmem>>, %arg7: memref<8x256xf32, #tpu.memory_space<vmem>>) attributes {dimension_semantics = [#tpu.dimension_semantics<parallel>, #tpu.dimension_semantics<parallel>, #tpu.dimension_semantics<arbitrary>], iteration_bounds = array<i64: 1, 1, 6>, scalar_prefetch = 0 : i64, scratch_operands = 1 : i64, tpu.core_type = #tpu.core_type<tc>, window_params = [{transform_indices = @transform_0, window_bounds = array<i64: 8, 384>}, {transform_indices = @transform_1, window_bounds = array<i64: 384, 256>}, {transform_indices = @transform_2, window_bounds = array<i64: 1, 256>}, {transform_indices = @transform_3, window_bounds = array<i64: 8, 256>}]} {
    %c0_i32 = arith.constant 0 : i32
    %0 = arith.cmpi eq, %arg2, %c0_i32 : i32
    %1 = arith.extui %0 : i1 to i32
    %c0_i32_0 = arith.constant 0 : i32
    %2 = arith.cmpi ne, %1, %c0_i32_0 : i32
    scf.if %2 {
      %cst_9 = arith.constant 0.000000e+00 : f32
      %12 = vector.broadcast %cst_9 : f32 to vector<8x256xf32>
      %c0_10 = arith.constant 0 : index
      %c0_11 = arith.constant 0 : index
      %13 = vector.load %arg7[%c0_10, %c0_11] : memref<8x256xf32, #tpu.memory_space<vmem>>, vector<8x256xf32>
      tpu.vector_store %arg7[%c0_10, %c0_11], %12 {strides = array<i32>} : memref<8x256xf32, #tpu.memory_space<vmem>>, vector<8x256xf32>,
    } else {
    }
    %c0 = arith.constant 0 : index
    %c0_1 = arith.constant 0 : index
    %3 = vector.load %arg7[%c0, %c0_1] : memref<8x256xf32, #tpu.memory_space<vmem>>, vector<8x256xf32>
    %c0_2 = arith.constant 0 : index
    %c0_3 = arith.constant 0 : index
    %4 = vector.load %arg3[%c0_2, %c0_3] : memref<8x384xbf16, #tpu.memory_space<vmem>>, vector<8x384xbf16>
    %c0_4 = arith.constant 0 : index
    %c0_5 = arith.constant 0 : index
    %5 = vector.load %arg4[%c0_4, %c0_5] : memref<384x256xbf16, #tpu.memory_space<vmem>>, vector<384x256xbf16>
    %cst = arith.constant dense<0.000000e+00> : vector<8x256xf32>
    %6 = tpu.matmul %4, %5, %cst {dimension_numbers = #tpu.dot_dimension_numbers<[1], [0], [0], [1], [0, 0, 1, 1], [], []>} : vector<8x384xbf16>, vector<384x256xbf16>, vector<8x256xf32> -> vector<8x256xf32>
    %7 = arith.addf %3, %6 : vector<8x256xf32>
    %c0_6 = arith.constant 0 : index
    %c0_7 = arith.constant 0 : index
    %8 = vector.load %arg7[%c0_6, %c0_7] : memref<8x256xf32, #tpu.memory_space<vmem>>, vector<8x256xf32>
    tpu.vector_store %arg7[%c0_6, %c0_7], %7 {strides = array<i32>} : memref<8x256xf32, #tpu.memory_space<vmem>>, vector<8x256xf32>,
    %c5_i32 = arith.constant 5 : i32
    %9 = arith.cmpi eq, %arg2, %c5_i32 : i32
    %10 = arith.extui %9 : i1 to i32
    %c0_i32_8 = arith.constant 0 : i32
    %11 = arith.cmpi ne, %10, %c0_i32_8 : i32
    scf.if %11 {
      %c0_9 = arith.constant 0 : index
      %c0_10 = arith.constant 0 : index
      %12 = vector.load %arg7[%c0_9, %c0_10] : memref<8x256xf32, #tpu.memory_space<vmem>>, vector<8x256xf32>
      %c0_11 = arith.constant 0 : index
      %c0_12 = arith.constant 0 : index
      %13 = vector.load %arg5[%c0_11, %c0_12] : memref<1x256xf32, #tpu.memory_space<vmem>>, vector<1x256xf32>
      %14 = vector.broadcast %13 : vector<1x256xf32> to vector<8x256xf32>
      %15 = arith.addf %12, %14 : vector<8x256xf32>
      %cst_13 = arith.constant 0.000000e+00 : f32
      %16 = vector.broadcast %cst_13 : f32 to vector<8x256xf32>
      %17 = arith.maximumf %15, %16 : vector<8x256xf32>
      %18 = arith.truncf %17 : vector<8x256xf32> to vector<8x256xbf16>
      %c0_14 = arith.constant 0 : index
      %c0_15 = arith.constant 0 : index
      %19 = vector.load %arg6[%c0_14, %c0_15] : memref<8x256xbf16, #tpu.memory_space<vmem>>, vector<8x256xbf16>
      tpu.vector_store %arg6[%c0_14, %c0_15], %18 {strides = array<i32>} : memref<8x256xbf16, #tpu.memory_space<vmem>>, vector<8x256xbf16>,
    } else {
    }
    return
  }
  func.func @transform_0(%arg0: i32, %arg1: i32, %arg2: i32) -> (i32, i32) {
    %c0_i32 = arith.constant 0 : i32
    return %arg0, %arg2 : i32, i32
  }
  func.func @transform_1(%arg0: i32, %arg1: i32, %arg2: i32) -> (i32, i32) {
    %c0_i32 = arith.constant 0 : i32
    return %arg2, %arg1 : i32, i32
  }
  func.func @transform_2(%arg0: i32, %arg1: i32, %arg2: i32) -> (i32, i32) {
    %c0_i32 = arith.constant 0 : i32
    %c0_i32_0 = arith.constant 0 : i32
    return %c0_i32, %arg1 : i32, i32
  }
  func.func @transform_3(%arg0: i32, %arg1: i32, %arg2: i32) -> (i32, i32) {
    %c0_i32 = arith.constant 0 : i32
    return %arg0, %arg1 : i32, i32
  }
}

</mosaic_0001>

<bundles_post_ra>
// kernel: depthnet_forward.5
= control target key start
LH: loop header
LB: loop body
LE: loop exit
PB: predicated region body
PF: predicated region fallthrough
CT: control target
= control target key end

     0   :  { %8 = vsyncpa [#allocation4], 0  ;;  %s2256_s0 = inlined_call_operand.hbm [shape: bf16[512,128], index: 0, kind: input, shape index: {}]   ;;  %s2257_s1 = inlined_call_operand.hbm [shape: bf16[128,128], index: 1, kind: input, shape index: {}]   ;;  %s2258_s2 = inlined_call_operand.hbm [shape: f32[1,128], index: 2, kind: input, shape index: {}]   ;;  %s2259_s3 = inlined_call_operand.hbm [shape: bf16[512,128], index: 3, kind: output, shape index: {}]  }
   0x1   :  { %9 = vsyncpa [#allocation7], 0 }
   0x2   :  { %10 = vsyncpa [#allocation5], 0  ;;  %s2100_s12 = smov [#allocation6]   ;;  %s2101_s14 = smov [#allocation3]  }
   0x3   :  { %s28_s13 = sshll.u32 %s2100_s12, 4  ;;  %s16_s15 = sshll.u32 %s2101_s14, 4  ;;  %s29_s13 = int_to_ptr.vmem [resolvable:$true] %s28_s13  ;;  %s2126_s15 = int_to_ptr.vmem [resolvable:$true] %s16_s15 }
   0x4   :  { %s2006_s18 = scalar_lea.hbm %s2257_s1, 1024 }
   0x5   :  { %p2007_p0 = scmp.ne.s32.totalorder %s2257_s1, %s2006_s18  ;;  %p2010_p1 = scmp.lt.u32.totalorder %s2006_s18, %s2257_s1 }
   0x7   :  { %p2012_p2 = pnand %p2010_p1, %p2007_p0 }
   0x9   :  { %2015 = shalt.err (!%p2012_p2)
}
   0xa   :  { %s2016_s23 = scalar_lea.vmem %s29_s13, 1024  ;;  %p2021_p4 = scmp.lt.s32.totalorder %s29_s13, %s29_s13 }
   0xb   :  { %p2017_p3 = scmp.ne.s32.totalorder %s29_s13, %s2016_s23  ;;  %p2022_p5 = scmp.lt.s32.totalorder %s2016_s23, %s2016_s23 }
   0xd   :  { %p2023_p6 = por %p2022_p5, %p2021_p4 }
   0xf   :  { %p2024_p7 = pnand %p2023_p6, %p2017_p3 }
  0x11   :  { %2027 = shalt.err (!%p2024_p7)
}
  0x12   :  { %s2102_s24 = smov 64   ;;  %s2103_s25 = smov 4  }
  0x13   :  { %34 = dma.hbm_to_vmem [thread:$0]  %s2257_s1, 1024, %s29_s13, [#allocation7], %s2102_s24, %s2102_s24, %s2103_s25  }
  0x14   :  { %s2028_s30 = scalar_lea.hbm %s2256_s0, 4096 }
  0x15   :  { %p2029_p8 = scmp.ne.s32.totalorder %s2256_s0, %s2028_s30  ;;  %p2032_p9 = scmp.lt.u32.totalorder %s2028_s30, %s2256_s0 }
  0x17   :  { %p2034_p10 = pnand %p2032_p9, %p2029_p8 }
  0x19   :  { %2037 = shalt.err (!%p2034_p10)
}
  0x1a   :  { %s2038_s8 = scalar_lea.vmem %s2126_s15, 4096  ;;  %p2043_p12 = scmp.lt.s32.totalorder %s2126_s15, %s2126_s15 }
  0x1b   :  { %p2039_p11 = scmp.ne.s32.totalorder %s2126_s15, %s2038_s8  ;;  %p2044_p13 = scmp.lt.s32.totalorder %s2038_s8, %s2038_s8 }
  0x1d   :  { %p2045_p0 = por %p2044_p13, %p2043_p12 }
  0x1f   :  { %p2046_p1 = pnand %p2045_p0, %p2039_p11 }
  0x21   :  { %2049 = shalt.err (!%p2046_p1)
}
  0x22   :  { %22 = dma.hbm_to_vmem [thread:$0]  %s2256_s0, 4096, %s2126_s15, [#allocation4], %s2102_s24, %s2102_s24, %s2103_s25  }
  0x23   :  { %s2104_s10 = smov [#allocation8]   ;;  %s2050_s14 = scalar_lea.hbm %s2258_s2, 16 }
  0x24   :  { %s41_s11 = sshll.u32 %s2104_s10, 4  ;;  %p2051_p2 = scmp.ne.s32.totalorder %s2258_s2, %s2050_s14  ;;  %s42_s11 = int_to_ptr.vmem [resolvable:$true] %s41_s11 }
  0x25   :  { %p2054_p3 = scmp.lt.u32.totalorder %s2050_s14, %s2258_s2 }
  0x27   :  { %p2056_p4 = pnand %p2054_p3, %p2051_p2 }
  0x29   :  { %2059 = shalt.err (!%p2056_p4)
}
  0x2a   :  { %s2060_s20 = scalar_lea.vmem %s42_s11, 16  ;;  %s2064_s0 = scalar_lea.vmem %s42_s11, 32 }
  0x2b   :  { %p2061_p5 = scmp.ne.s32.totalorder %s42_s11, %s2060_s20  ;;  %p2065_p6 = scmp.lt.s32.totalorder %s42_s11, %s42_s11 }
  0x2c   :  { %p2066_p7 = scmp.lt.s32.totalorder %s2064_s0, %s2060_s20 }
  0x2e   :  { %p2067_p8 = por %p2066_p7, %p2065_p6 }
  0x30   :  { %p2068_p9 = pnand %p2067_p8, %p2061_p5 }
  0x32   :  { %2071 = shalt.err (!%p2068_p9)
}
  0x33   :  { %44 = dma.hbm_to_vmem [thread:$0]  %s2258_s2, 16, %s42_s11, [#allocation7]  }
  0x34   :  { %2094 = dma.done.wait [#allocation4], 4096  }
  0x35   :  { %2095 = vsyncadd [#allocation4], 4294963200 }
  0x36   :  { %2096 = dma.done.wait [#allocation7], 1040  }
  0x37   :  { %2097 = vsyncadd [#allocation7], 4294966256  ;;  %v1966_v0 = vld [vmem:[#allocation6] sm:$0xff]   ;;  %v1967_v1 = vld [vmem:[#allocation6 + $0x8] sm:$0xff]   ;;  %s2105_s2 = smov [#allocation9]  }
  0x38   :  { %1864 = vmatprep.subr.bf16.mxu0 %v1966_v0  ;;  %1944 = vmatprep.subr.bf16.mxu1 %v1966_v0  ;;  %v1968_v2 = vld [vmem:[#allocation6 + $0x10] sm:$0xff]   ;;  %v1969_v3 = vld [vmem:[#allocation6 + $0x18] sm:$0xff]   ;;  %v1974_v4 = vld [vmem:[#allocation3] sm:$0xff]   ;;  %s1451_s22 = sshll.u32 %s2105_s2, 4  ;;  %s1452_s22 = int_to_ptr.vmem [resolvable:$true] %s1451_s22 }
  0x39   :  { %1865 = vmatpush3.bf16.msra.mxu0 %v1966_v0  ;;  %1952 = vmatpush3.bf16.msra.mxu1 %v1966_v0  ;;  %v1975_v5 = vld [vmem:[#allocation3 + $0x80] sm:$0xff]   ;;  %v1971_v7 = vld [vmem:[#allocation6 + $0x28] sm:$0xff]   ;;  %v1972_v8 = vld [vmem:[#allocation6 + $0x30] sm:$0xff]   ;;  %s2072_s23 = scalar_lea.vmem %s1452_s22, 4096  ;;  %p2077_p11 = scmp.lt.s32.totalorder %s1452_s22, %s1452_s22 }
  0x3a   :  { %1866 = vmatprep.subr.bf16.mxu0 %v1967_v1  ;;  %1945 = vmatprep.subr.bf16.mxu1 %v1967_v1  ;;  %v1970_v6 = vld [vmem:[#allocation6 + $0x20] sm:$0xff]   ;;  %v1973_v9 = vld [vmem:[#allocation6 + $0x38] sm:$0xff]   ;;  %v1976_v10 = vld [vmem:[#allocation3 + $0x8] sm:$0xff]   ;;  %p2073_p10 = scmp.ne.s32.totalorder %s1452_s22, %s2072_s23  ;;  %p2078_p12 = scmp.lt.s32.totalorder %s2072_s23, %s2072_s23 }
  0x3b   :  { %1880 = vmatprep.mubr.bf16.mxu0 %v1974_v4  ;;  %1912 = vmatprep.mubr.bf16.mxu1 %v1975_v5  ;;  %v1977_v11 = vld [vmem:[#allocation3 + $0x88] sm:$0xff]   ;;  %v1978_v12 = vld [vmem:[#allocation3 + $0x10] sm:$0xff]   ;;  %v1980_v14 = vld [vmem:[#allocation3 + $0x18] sm:$0xff]  }
  0x3c   :  { %v1979_v13 = vld [vmem:[#allocation3 + $0x90] sm:$0xff]   ;;  %v1981_v15 = vld [vmem:[#allocation3 + $0x98] sm:$0xff]   ;;  %v1982_v16 = vld [vmem:[#allocation3 + $0x20] sm:$0xff]   ;;  %p2079_p13 = por %p2078_p12, %p2077_p11 }
  0x3d   :  { %1867 = vmatpush3.bf16.msra.mxu0 %v1967_v1  ;;  %1953 = vmatpush3.bf16.msra.mxu1 %v1967_v1  ;;  %v1983_v17 = vld [vmem:[#allocation3 + $0xa0] sm:$0xff]   ;;  %v1984_v18 = vld [vmem:[#allocation3 + $0x28] sm:$0xff]   ;;  %v1986_v20 = vld [vmem:[#allocation3 + $0x30] sm:$0xff]  }
  0x3e   :  { %1868 = vmatprep.subr.bf16.mxu0 %v1968_v2  ;;  %1946 = vmatprep.subr.bf16.mxu1 %v1968_v2  ;;  %v1985_v19 = vld [vmem:[#allocation3 + $0xa8] sm:$0xff]   ;;  %v1987_v21 = vld [vmem:[#allocation3 + $0xb0] sm:$0xff]   ;;  %v1988_v22 = vld [vmem:[#allocation3 + $0x38] sm:$0xff]   ;;  %p2080_p0 = pnand %p2079_p13, %p2073_p10 }
  0x3f   :  { %v1989_v23 = vld [vmem:[#allocation3 + $0xb8] sm:$0xff]   ;;  %v1990_v24 = vld [vmem:[#allocation3 + $0x40] sm:$0xff]   ;;  %v1992_v26 = vld [vmem:[#allocation3 + $0x48] sm:$0xff]  }
  0x40   :  { %v1991_v25 = vld [vmem:[#allocation3 + $0xc0] sm:$0xff]   ;;  %v1993_v27 = vld [vmem:[#allocation3 + $0xc8] sm:$0xff]   ;;  %v1994_v28 = vld [vmem:[#allocation3 + $0x50] sm:$0xff]  }
  0x41   :  { %1869 = vmatpush3.bf16.msra.mxu0 %v1968_v2  ;;  %1954 = vmatpush3.bf16.msra.mxu1 %v1968_v2  ;;  %v1995_v29 = vld [vmem:[#allocation3 + $0xd0] sm:$0xff]   ;;  %v1996_v30 = vld [vmem:[#allocation3 + $0x58] sm:$0xff]   ;;  %v1998_v32 = vld [vmem:[#allocation3 + $0x60] sm:$0xff]  }
  0x42   :  { %1870 = vmatprep.subr.bf16.mxu0 %v1969_v3  ;;  %1947 = vmatprep.subr.bf16.mxu1 %v1969_v3  ;;  %v1997_v31 = vld [vmem:[#allocation3 + $0xd8] sm:$0xff]   ;;  %v1999_v33 = vld [vmem:[#allocation3 + $0xe0] sm:$0xff]   ;;  %v2000_v34 = vld [vmem:[#allocation3 + $0x68] sm:$0xff]  }
  0x43   :  { %v2001_v35 = vld [vmem:[#allocation3 + $0xe8] sm:$0xff]   ;;  %v2002_v36 = vld [vmem:[#allocation3 + $0x70] sm:$0xff]   ;;  %v2004_v38 = vld [vmem:[#allocation3 + $0x78] sm:$0xff]  }
  0x44   :  { %v2003_v37 = vld [vmem:[#allocation3 + $0xf0] sm:$0xff]   ;;  %v2005_v39 = vld [vmem:[#allocation3 + $0xf8] sm:$0xff]   ;;  %v2175_v40 = vld [vmem:[#allocation8] ss:$0 sm:$0xff] }
  0x45   :  { %1871 = vmatpush3.bf16.msra.mxu0 %v1969_v3  ;;  %1955 = vmatpush3.bf16.msra.mxu1 %v1969_v3 }
  0x46   :  { %1872 = vmatprep.subr.bf16.mxu0 %v1970_v6  ;;  %1948 = vmatprep.subr.bf16.mxu1 %v1970_v6 }
  0x49   :  { %1873 = vmatpush3.bf16.msra.mxu0 %v1970_v6  ;;  %1956 = vmatpush3.bf16.msra.mxu1 %v1970_v6 }
  0x4a   :  { %1874 = vmatprep.subr.bf16.mxu0 %v1971_v7  ;;  %1949 = vmatprep.subr.bf16.mxu1 %v1971_v7 }
  0x4d   :  { %1875 = vmatpush3.bf16.msra.mxu0 %v1971_v7  ;;  %1957 = vmatpush3.bf16.msra.mxu1 %v1971_v7 }
  0x4e   :  { %1876 = vmatprep.subr.bf16.mxu0 %v1972_v8  ;;  %1950 = vmatprep.subr.bf16.mxu1 %v1972_v8 }
  0x51   :  { %1877 = vmatpush3.bf16.msra.mxu0 %v1972_v8  ;;  %1958 = vmatpush3.bf16.msra.mxu1 %v1972_v8 }
  0x52   :  { %1878 = vmatprep.subr.bf16.mxu0 %v1973_v9  ;;  %1951 = vmatprep.subr.bf16.mxu1 %v1973_v9 }
  0x55   :  { %1879 = vmatpush3.bf16.msra.mxu0 %v1973_v9  ;;  %1959 = vmatpush3.bf16.msra.mxu1 %v1973_v9 }
  0x58   :  { %1881 = vmatmul.mubr.bf16.vlgmr.msra.gmra.mrb[0].mxu0 %v1976_v10  ;;  %1913 = vmatmul.mubr.bf16.vlgmr.msra.gmra.mrb[0].mxu1 %v1977_v11 }
  0x59   :  { %1884 = vmatprep.mubr.bf16.mxu0 %v1978_v12  ;;  %1916 = vmatprep.mubr.bf16.mxu1 %v1979_v13 }
  0x60   :  { %1885 = vmatmul.mubr.bf16.gmra.mrb[4].mxu0 %v1980_v14  ;;  %1917 = vmatmul.mubr.bf16.gmra.mrb[4].mxu1 %v1981_v15 }
  0x61   :  { %1888 = vmatprep.mubr.bf16.mxu0 %v1982_v16  ;;  %1920 = vmatprep.mubr.bf16.mxu1 %v1983_v17 }
  0x68   :  { %1889 = vmatmul.mubr.bf16.gmra.mrb[8].mxu0 %v1984_v18  ;;  %1921 = vmatmul.mubr.bf16.gmra.mrb[8].mxu1 %v1985_v19 }
  0x69   :  { %1892 = vmatprep.mubr.bf16.mxu0 %v1986_v20  ;;  %1924 = vmatprep.mubr.bf16.mxu1 %v1987_v21 }
  0x70   :  { %1893 = vmatmul.mubr.bf16.gmra.mrb[12].mxu0 %v1988_v22  ;;  %1925 = vmatmul.mubr.bf16.gmra.mrb[12].mxu1 %v1989_v23 }
  0x71   :  { %1896 = vmatprep.mubr.bf16.mxu0 %v1990_v24  ;;  %1928 = vmatprep.mubr.bf16.mxu1 %v1991_v25 }
  0x78   :  { %1897 = vmatmul.mubr.bf16.gmra.mrb[16].mxu0 %v1992_v26  ;;  %1929 = vmatmul.mubr.bf16.gmra.mrb[16].mxu1 %v1993_v27 }
  0x79   :  { %1900 = vmatprep.mubr.bf16.mxu0 %v1994_v28  ;;  %1932 = vmatprep.mubr.bf16.mxu1 %v1995_v29 }
  0x80   :  { %1901 = vmatmul.mubr.bf16.gmra.mrb[20].mxu0 %v1996_v30  ;;  %1933 = vmatmul.mubr.bf16.gmra.mrb[20].mxu1 %v1997_v31 }
  0x81   :  { %1904 = vmatprep.mubr.bf16.mxu0 %v1998_v32  ;;  %1936 = vmatprep.mubr.bf16.mxu1 %v1999_v33 }
  0x88   :  { %1905 = vmatmul.mubr.bf16.gmra.mrb[24].mxu0 %v2000_v34  ;;  %1937 = vmatmul.mubr.bf16.gmra.mrb[24].mxu1 %v2001_v35 }
  0x89   :  { %1908 = vmatprep.mubr.bf16.mxu0 %v2002_v36  ;;  %1940 = vmatprep.mubr.bf16.mxu1 %v2003_v37 }
  0x90   :  { %1909 = vmatmul.mubr.bf16.gmra.mrb[28].mxu0 %v2004_v38  ;;  %1941 = vmatmul.mubr.bf16.gmra.mrb[28].mxu1 %v2005_v39 }
 0x12b   :  { %v1882_v41 = vpop.f32.mrb[0].mxu0  ;;  %v1914_v42 = vpop.f32.mrb[0].mxu1 }
 0x12c   :  { %v1000_v43 = vadd.f32 %v1882_v41, %v2175_v40  ;;  %v1032_v44 = vadd.f32 %v1914_v42, %v2175_v40  ;;  %v541_v45 = vpop.f32.mrb[1].mxu0  ;;  %v669_v46 = vpop.f32.mrb[1].mxu1 }
 0x12d   :  { %v998_v47 = vadd.f32 %v2175_v40, %v541_v45  ;;  %v1030_v48 = vadd.f32 %v2175_v40, %v669_v46  ;;  %v1883_v49 = vpop.f32.mrb[2].mxu0  ;;  %v1915_v50 = vpop.f32.mrb[2].mxu1 }
 0x12e   :  { %v1001_v51 = vadd.f32 %v1883_v49, %v2175_v40  ;;  %v1033_v52 = vadd.f32 %v1915_v50, %v2175_v40  ;;  %v544_v53 = vpop.f32.mrb[3].mxu0  ;;  %v672_v54 = vpop.f32.mrb[3].mxu1  ;;  %v1064_v57 = vmax.f32 %v1000_v43, 0.0  ;;  %v1096_v58 = vmax.f32 %v1032_v44, 0.0 }
 0x12f   :  { %v999_v55 = vadd.f32 %v2175_v40, %v544_v53  ;;  %v1031_v56 = vadd.f32 %v2175_v40, %v672_v54  ;;  %v1062_v61 = vmax.f32 %v998_v47, 0.0  ;;  %v1094_v62 = vmax.f32 %v1030_v48, 0.0 }
 0x130   :  { %v1065_v59 = vmax.f32 %v1001_v51, 0.0  ;;  %v1097_v60 = vmax.f32 %v1033_v52, 0.0 }
 0x131   :  { %v1063_v63 = vmax.f32 %v999_v55, 0.0  ;;  %v1095_v0 = vmax.f32 %v1031_v56, 0.0 }
 0x132   :  { %v1641_v1 = vpack.c.bf16 %v1065_v59, %v1064_v57  ;;  %v1721_v2 = vpack.c.bf16 %v1097_v60, %v1096_v58 }
 0x133   :  { %v1636_v3 = vpack.c.bf16 %v1063_v63, %v1062_v61  ;;  %v1716_v4 = vpack.c.bf16 %v1095_v0, %v1094_v62  ;;  %v1886_v5 = vpop.f32.mrb[4].mxu0  ;;  %v1918_v6 = vpop.f32.mrb[4].mxu1 }
 0x134   :  { %1793 = vst [vmem:[#allocation9 + $0x8] sm:$0xff] %v1641_v1   ;;  %1809 = vst [vmem:[#allocation9 + $0x88] sm:$0xff] %v1721_v2   ;;  %v1004_v7 = vadd.f32 %v1886_v5, %v2175_v40  ;;  %v1036_v8 = vadd.f32 %v1918_v6, %v2175_v40  ;;  %v557_v9 = vpop.f32.mrb[5].mxu0  ;;  %v685_v10 = vpop.f32.mrb[5].mxu1 }
 0x135   :  { %1637 = vst [vmem:[#allocation9] sm:$0xff] %v1636_v3   ;;  %1808 = vst [vmem:[#allocation9 + $0x80] sm:$0xff] %v1716_v4   ;;  %v1002_v11 = vadd.f32 %v2175_v40, %v557_v9  ;;  %v1034_v12 = vadd.f32 %v2175_v40, %v685_v10  ;;  %v1887_v13 = vpop.f32.mrb[6].mxu0  ;;  %v1919_v14 = vpop.f32.mrb[6].mxu1 }
 0x136   :  { %v1005_v15 = vadd.f32 %v1887_v13, %v2175_v40  ;;  %v1037_v16 = vadd.f32 %v1919_v14, %v2175_v40  ;;  %v560_v17 = vpop.f32.mrb[7].mxu0  ;;  %v688_v18 = vpop.f32.mrb[7].mxu1  ;;  %v1068_v21 = vmax.f32 %v1004_v7, 0.0  ;;  %v1100_v22 = vmax.f32 %v1036_v8, 0.0 }
 0x137   :  { %v1003_v19 = vadd.f32 %v2175_v40, %v560_v17  ;;  %v1035_v20 = vadd.f32 %v2175_v40, %v688_v18  ;;  %v1066_v25 = vmax.f32 %v1002_v11, 0.0  ;;  %v1098_v26 = vmax.f32 %v1034_v12, 0.0 }
 0x138   :  { %v1069_v23 = vmax.f32 %v1005_v15, 0.0  ;;  %v1101_v24 = vmax.f32 %v1037_v16, 0.0 }
 0x139   :  { %v1067_v27 = vmax.f32 %v1003_v19, 0.0  ;;  %v1099_v28 = vmax.f32 %v1035_v20, 0.0 }
 0x13a   :  { %v1651_v29 = vpack.c.bf16 %v1069_v23, %v1068_v21  ;;  %v1731_v30 = vpack.c.bf16 %v1101_v24, %v1100_v22 }
 0x13b   :  { %v1646_v31 = vpack.c.bf16 %v1067_v27, %v1066_v25  ;;  %v1726_v32 = vpack.c.bf16 %v1099_v28, %v1098_v26  ;;  %v1890_v33 = vpop.f32.mrb[8].mxu0  ;;  %v1922_v34 = vpop.f32.mrb[8].mxu1 }
 0x13c   :  { %1795 = vst [vmem:[#allocation9 + $0x18] sm:$0xff] %v1651_v29   ;;  %1811 = vst [vmem:[#allocation9 + $0x98] sm:$0xff] %v1731_v30   ;;  %v1008_v35 = vadd.f32 %v1890_v33, %v2175_v40  ;;  %v1040_v36 = vadd.f32 %v1922_v34, %v2175_v40  ;;  %v573_v37 = vpop.f32.mrb[9].mxu0  ;;  %v701_v38 = vpop.f32.mrb[9].mxu1 }
 0x13d   :  { %1794 = vst [vmem:[#allocation9 + $0x10] sm:$0xff] %v1646_v31   ;;  %1810 = vst [vmem:[#allocation9 + $0x90] sm:$0xff] %v1726_v32   ;;  %v1006_v39 = vadd.f32 %v2175_v40, %v573_v37  ;;  %v1038_v41 = vadd.f32 %v2175_v40, %v701_v38  ;;  %v1891_v42 = vpop.f32.mrb[10].mxu0  ;;  %v1923_v43 = vpop.f32.mrb[10].mxu1 }
 0x13e   :  { %v1009_v44 = vadd.f32 %v1891_v42, %v2175_v40  ;;  %v1041_v45 = vadd.f32 %v1923_v43, %v2175_v40  ;;  %v576_v46 = vpop.f32.mrb[11].mxu0  ;;  %v704_v47 = vpop.f32.mrb[11].mxu1  ;;  %v1072_v50 = vmax.f32 %v1008_v35, 0.0  ;;  %v1104_v51 = vmax.f32 %v1040_v36, 0.0 }
 0x13f   :  { %v1007_v48 = vadd.f32 %v2175_v40, %v576_v46  ;;  %v1039_v49 = vadd.f32 %v2175_v40, %v704_v47  ;;  %v1070_v54 = vmax.f32 %v1006_v39, 0.0  ;;  %v1102_v55 = vmax.f32 %v1038_v41, 0.0 }
 0x140   :  { %v1073_v52 = vmax.f32 %v1009_v44, 0.0  ;;  %v1105_v53 = vmax.f32 %v1041_v45, 0.0 }
 0x141   :  { %v1071_v56 = vmax.f32 %v1007_v48, 0.0  ;;  %v1103_v57 = vmax.f32 %v1039_v49, 0.0 }
 0x142   :  { %v1661_v58 = vpack.c.bf16 %v1073_v52, %v1072_v50  ;;  %v1741_v59 = vpack.c.bf16 %v1105_v53, %v1104_v51 }
 0x143   :  { %v1656_v60 = vpack.c.bf16 %v1071_v56, %v1070_v54  ;;  %v1736_v61 = vpack.c.bf16 %v1103_v57, %v1102_v55  ;;  %v1894_v62 = vpop.f32.mrb[12].mxu0  ;;  %v1926_v63 = vpop.f32.mrb[12].mxu1 }
 0x144   :  { %1797 = vst [vmem:[#allocation9 + $0x28] sm:$0xff] %v1661_v58   ;;  %1813 = vst [vmem:[#allocation9 + $0xa8] sm:$0xff] %v1741_v59   ;;  %v1012_v0 = vadd.f32 %v1894_v62, %v2175_v40  ;;  %v1044_v1 = vadd.f32 %v1926_v63, %v2175_v40  ;;  %v589_v2 = vpop.f32.mrb[13].mxu0  ;;  %v717_v3 = vpop.f32.mrb[13].mxu1 }
 0x145   :  { %1796 = vst [vmem:[#allocation9 + $0x20] sm:$0xff] %v1656_v60   ;;  %1812 = vst [vmem:[#allocation9 + $0xa0] sm:$0xff] %v1736_v61   ;;  %v1010_v4 = vadd.f32 %v2175_v40, %v589_v2  ;;  %v1042_v5 = vadd.f32 %v2175_v40, %v717_v3  ;;  %v1895_v6 = vpop.f32.mrb[14].mxu0  ;;  %v1927_v7 = vpop.f32.mrb[14].mxu1 }
 0x146   :  { %v1013_v8 = vadd.f32 %v1895_v6, %v2175_v40  ;;  %v1045_v9 = vadd.f32 %v1927_v7, %v2175_v40  ;;  %v592_v10 = vpop.f32.mrb[15].mxu0  ;;  %v720_v11 = vpop.f32.mrb[15].mxu1  ;;  %v1076_v14 = vmax.f32 %v1012_v0, 0.0  ;;  %v1108_v15 = vmax.f32 %v1044_v1, 0.0 }
 0x147   :  { %v1011_v12 = vadd.f32 %v2175_v40, %v592_v10  ;;  %v1043_v13 = vadd.f32 %v2175_v40, %v720_v11  ;;  %v1074_v18 = vmax.f32 %v1010_v4, 0.0  ;;  %v1106_v19 = vmax.f32 %v1042_v5, 0.0 }
 0x148   :  { %v1077_v16 = vmax.f32 %v1013_v8, 0.0  ;;  %v1109_v17 = vmax.f32 %v1045_v9, 0.0 }
 0x149   :  { %v1075_v20 = vmax.f32 %v1011_v12, 0.0  ;;  %v1107_v21 = vmax.f32 %v1043_v13, 0.0 }
 0x14a   :  { %v1671_v22 = vpack.c.bf16 %v1077_v16, %v1076_v14  ;;  %v1751_v23 = vpack.c.bf16 %v1109_v17, %v1108_v15 }
 0x14b   :  { %v1666_v24 = vpack.c.bf16 %v1075_v20, %v1074_v18  ;;  %v1746_v25 = vpack.c.bf16 %v1107_v21, %v1106_v19  ;;  %v1898_v26 = vpop.f32.mrb[16].mxu0  ;;  %v1930_v27 = vpop.f32.mrb[16].mxu1 }
 0x14c   :  { %1799 = vst [vmem:[#allocation9 + $0x38] sm:$0xff] %v1671_v22   ;;  %1815 = vst [vmem:[#allocation9 + $0xb8] sm:$0xff] %v1751_v23   ;;  %v1016_v28 = vadd.f32 %v1898_v26, %v2175_v40  ;;  %v1048_v29 = vadd.f32 %v1930_v27, %v2175_v40  ;;  %v605_v30 = vpop.f32.mrb[17].mxu0  ;;  %v733_v31 = vpop.f32.mrb[17].mxu1 }
 0x14d   :  { %1798 = vst [vmem:[#allocation9 + $0x30] sm:$0xff] %v1666_v24   ;;  %1814 = vst [vmem:[#allocation9 + $0xb0] sm:$0xff] %v1746_v25   ;;  %v1014_v32 = vadd.f32 %v2175_v40, %v605_v30  ;;  %v1046_v33 = vadd.f32 %v2175_v40, %v733_v31  ;;  %v1899_v34 = vpop.f32.mrb[18].mxu0  ;;  %v1931_v35 = vpop.f32.mrb[18].mxu1 }
 0x14e   :  { %v1017_v36 = vadd.f32 %v1899_v34, %v2175_v40  ;;  %v1049_v37 = vadd.f32 %v1931_v35, %v2175_v40  ;;  %v608_v38 = vpop.f32.mrb[19].mxu0  ;;  %v736_v39 = vpop.f32.mrb[19].mxu1  ;;  %v1080_v43 = vmax.f32 %v1016_v28, 0.0  ;;  %v1112_v44 = vmax.f32 %v1048_v29, 0.0 }
 0x14f   :  { %v1015_v41 = vadd.f32 %v2175_v40, %v608_v38  ;;  %v1047_v42 = vadd.f32 %v2175_v40, %v736_v39  ;;  %v1078_v47 = vmax.f32 %v1014_v32, 0.0  ;;  %v1110_v48 = vmax.f32 %v1046_v33, 0.0 }
 0x150   :  { %v1081_v45 = vmax.f32 %v1017_v36, 0.0  ;;  %v1113_v46 = vmax.f32 %v1049_v37, 0.0 }
 0x151   :  { %v1079_v49 = vmax.f32 %v1015_v41, 0.0  ;;  %v1111_v50 = vmax.f32 %v1047_v42, 0.0 }
 0x152   :  { %v1681_v51 = vpack.c.bf16 %v1081_v45, %v1080_v43  ;;  %v1761_v52 = vpack.c.bf16 %v1113_v46, %v1112_v44 }
 0x153   :  { %v1676_v53 = vpack.c.bf16 %v1079_v49, %v1078_v47  ;;  %v1756_v54 = vpack.c.bf16 %v1111_v50, %v1110_v48  ;;  %v1902_v55 = vpop.f32.mrb[20].mxu0  ;;  %v1934_v56 = vpop.f32.mrb[20].mxu1 }
 0x154   :  { %1801 = vst [vmem:[#allocation9 + $0x48] sm:$0xff] %v1681_v51   ;;  %1817 = vst [vmem:[#allocation9 + $0xc8] sm:$0xff] %v1761_v52   ;;  %v1020_v57 = vadd.f32 %v1902_v55, %v2175_v40  ;;  %v1052_v58 = vadd.f32 %v1934_v56, %v2175_v40  ;;  %v621_v59 = vpop.f32.mrb[21].mxu0  ;;  %v749_v60 = vpop.f32.mrb[21].mxu1 }
 0x155   :  { %1800 = vst [vmem:[#allocation9 + $0x40] sm:$0xff] %v1676_v53   ;;  %1816 = vst [vmem:[#allocation9 + $0xc0] sm:$0xff] %v1756_v54   ;;  %v1018_v61 = vadd.f32 %v2175_v40, %v621_v59  ;;  %v1050_v62 = vadd.f32 %v2175_v40, %v749_v60  ;;  %v1903_v63 = vpop.f32.mrb[22].mxu0  ;;  %v1935_v0 = vpop.f32.mrb[22].mxu1 }
 0x156   :  { %v1021_v1 = vadd.f32 %v1903_v63, %v2175_v40  ;;  %v1053_v2 = vadd.f32 %v1935_v0, %v2175_v40  ;;  %v624_v3 = vpop.f32.mrb[23].mxu0  ;;  %v752_v4 = vpop.f32.mrb[23].mxu1  ;;  %v1084_v7 = vmax.f32 %v1020_v57, 0.0  ;;  %v1116_v8 = vmax.f32 %v1052_v58, 0.0 }
 0x157   :  { %v1019_v5 = vadd.f32 %v2175_v40, %v624_v3  ;;  %v1051_v6 = vadd.f32 %v2175_v40, %v752_v4  ;;  %v1082_v11 = vmax.f32 %v1018_v61, 0.0  ;;  %v1114_v12 = vmax.f32 %v1050_v62, 0.0 }
 0x158   :  { %v1085_v9 = vmax.f32 %v1021_v1, 0.0  ;;  %v1117_v10 = vmax.f32 %v1053_v2, 0.0 }
 0x159   :  { %v1083_v13 = vmax.f32 %v1019_v5, 0.0  ;;  %v1115_v14 = vmax.f32 %v1051_v6, 0.0 }
 0x15a   :  { %v1691_v15 = vpack.c.bf16 %v1085_v9, %v1084_v7  ;;  %v1771_v16 = vpack.c.bf16 %v1117_v10, %v1116_v8 }
 0x15b   :  { %v1686_v17 = vpack.c.bf16 %v1083_v13, %v1082_v11  ;;  %v1766_v18 = vpack.c.bf16 %v1115_v14, %v1114_v12  ;;  %v1906_v19 = vpop.f32.mrb[24].mxu0  ;;  %v1938_v20 = vpop.f32.mrb[24].mxu1 }
 0x15c   :  { %1803 = vst [vmem:[#allocation9 + $0x58] sm:$0xff] %v1691_v15   ;;  %1819 = vst [vmem:[#allocation9 + $0xd8] sm:$0xff] %v1771_v16   ;;  %v1024_v21 = vadd.f32 %v1906_v19, %v2175_v40  ;;  %v1056_v22 = vadd.f32 %v1938_v20, %v2175_v40  ;;  %v637_v23 = vpop.f32.mrb[25].mxu0  ;;  %v765_v24 = vpop.f32.mrb[25].mxu1 }
 0x15d   :  { %1802 = vst [vmem:[#allocation9 + $0x50] sm:$0xff] %v1686_v17   ;;  %1818 = vst [vmem:[#allocation9 + $0xd0] sm:$0xff] %v1766_v18   ;;  %v1022_v25 = vadd.f32 %v2175_v40, %v637_v23  ;;  %v1054_v26 = vadd.f32 %v2175_v40, %v765_v24  ;;  %v1907_v27 = vpop.f32.mrb[26].mxu0  ;;  %v1939_v28 = vpop.f32.mrb[26].mxu1 }
 0x15e   :  { %v1025_v29 = vadd.f32 %v1907_v27, %v2175_v40  ;;  %v1057_v30 = vadd.f32 %v1939_v28, %v2175_v40  ;;  %v640_v31 = vpop.f32.mrb[27].mxu0  ;;  %v768_v32 = vpop.f32.mrb[27].mxu1  ;;  %v1088_v35 = vmax.f32 %v1024_v21, 0.0  ;;  %v1120_v36 = vmax.f32 %v1056_v22, 0.0 }
 0x15f   :  { %v1023_v33 = vadd.f32 %v2175_v40, %v640_v31  ;;  %v1055_v34 = vadd.f32 %v2175_v40, %v768_v32  ;;  %v1086_v39 = vmax.f32 %v1022_v25, 0.0  ;;  %v1118_v41 = vmax.f32 %v1054_v26, 0.0 }
 0x160   :  { %v1089_v37 = vmax.f32 %v1025_v29, 0.0  ;;  %v1121_v38 = vmax.f32 %v1057_v30, 0.0 }
 0x161   :  { %v1087_v42 = vmax.f32 %v1023_v33, 0.0  ;;  %v1119_v43 = vmax.f32 %v1055_v34, 0.0 }
 0x162   :  { %v1701_v44 = vpack.c.bf16 %v1089_v37, %v1088_v35  ;;  %v1781_v45 = vpack.c.bf16 %v1121_v38, %v1120_v36 }
 0x163   :  { %v1696_v46 = vpack.c.bf16 %v1087_v42, %v1086_v39  ;;  %v1776_v47 = vpack.c.bf16 %v1119_v43, %v1118_v41  ;;  %v1910_v48 = vpop.f32.mrb[28].mxu0  ;;  %v1942_v49 = vpop.f32.mrb[28].mxu1 }
 0x164   :  { %1805 = vst [vmem:[#allocation9 + $0x68] sm:$0xff] %v1701_v44   ;;  %1821 = vst [vmem:[#allocation9 + $0xe8] sm:$0xff] %v1781_v45   ;;  %v1028_v50 = vadd.f32 %v1910_v48, %v2175_v40  ;;  %v1060_v51 = vadd.f32 %v1942_v49, %v2175_v40  ;;  %v653_v52 = vpop.f32.mrb[29].mxu0  ;;  %v781_v53 = vpop.f32.mrb[29].mxu1 }
 0x165   :  { %1804 = vst [vmem:[#allocation9 + $0x60] sm:$0xff] %v1696_v46   ;;  %1820 = vst [vmem:[#allocation9 + $0xe0] sm:$0xff] %v1776_v47   ;;  %v1026_v54 = vadd.f32 %v2175_v40, %v653_v52  ;;  %v1058_v55 = vadd.f32 %v2175_v40, %v781_v53  ;;  %v1911_v56 = vpop.f32.mrb[30].mxu0  ;;  %v1943_v57 = vpop.f32.mrb[30].mxu1 }
 0x166   :  { %v1029_v58 = vadd.f32 %v1911_v56, %v2175_v40  ;;  %v1061_v59 = vadd.f32 %v1943_v57, %v2175_v40  ;;  %v656_v60 = vpop.f32.mrb[31].mxu0  ;;  %v784_v61 = vpop.f32.mrb[31].mxu1  ;;  %v1092_v0 = vmax.f32 %v1028_v50, 0.0  ;;  %v1124_v1 = vmax.f32 %v1060_v51, 0.0 }
 0x167   :  { %v1027_v62 = vadd.f32 %v2175_v40, %v656_v60  ;;  %v1059_v63 = vadd.f32 %v2175_v40, %v784_v61  ;;  %v1090_v4 = vmax.f32 %v1026_v54, 0.0  ;;  %v1122_v5 = vmax.f32 %v1058_v55, 0.0 }
 0x168   :  { %v1093_v2 = vmax.f32 %v1029_v58, 0.0  ;;  %v1125_v3 = vmax.f32 %v1061_v59, 0.0 }
 0x169   :  { %v1091_v6 = vmax.f32 %v1027_v62, 0.0  ;;  %v1123_v7 = vmax.f32 %v1059_v63, 0.0 }
 0x16a   :  { %v1711_v8 = vpack.c.bf16 %v1093_v2, %v1092_v0  ;;  %v1791_v9 = vpack.c.bf16 %v1125_v3, %v1124_v1 }
 0x16b   :  { %v1706_v10 = vpack.c.bf16 %v1091_v6, %v1090_v4  ;;  %v1786_v11 = vpack.c.bf16 %v1123_v7, %v1122_v5 }
 0x16c   :  { %1807 = vst [vmem:[#allocation9 + $0x78] sm:$0xff] %v1711_v8   ;;  %1823 = vst [vmem:[#allocation9 + $0xf8] sm:$0xff] %v1791_v9  }
 0x16d   :  { %1806 = vst [vmem:[#allocation9 + $0x70] sm:$0xff] %v1706_v10   ;;  %1822 = vst [vmem:[#allocation9 + $0xf0] sm:$0xff] %v1786_v11  }
 0x16e   :  { %2083 = shalt.err (!%p2080_p0)
}
 0x16f   :  { %s2084_s28 = scalar_lea.hbm %s2259_s3, 4096 }
 0x170   :  { %p2085_p1 = scmp.ne.s32.totalorder %s2259_s3, %s2084_s28  ;;  %p2088_p2 = scmp.lt.u32.totalorder %s2084_s28, %s2259_s3 }
 0x172   :  { %p2090_p3 = pnand %p2088_p2, %p2085_p1 }
 0x174   :  { %2093 = shalt.err (!%p2090_p3)
}
 0x175   :  { %1457 = dma.vmem_to_hbm [thread:$0]  %s1452_s22, 4096, %s2259_s3, [#allocation5], %s2102_s24, %s2102_s24, %s2103_s25  }
 0x176   :  { %2098 = dma.done.wait [#allocation5], 4096  }
 0x177   :  { %2099 = vsyncadd [#allocation5], 4294963200 }
 0x178   :  { %1461 = vsyncpa [#allocation4], 1 }
 0x179   :  { %1462 = vsyncpa [#allocation7], 1 }
 0x17a   :  { %1463 = vsyncpa [#allocation5], 1 }

// kernel: depthnet_forward.6
= control target key start
LH: loop header
LB: loop body
LE: loop exit
PB: predicated region body
PF: predicated region fallthrough
CT: control target
= control target key end

     0   :  { %8 = vsyncpa [#allocation4], 0  ;;  %s2038_s0 = inlined_call_operand.hbm [shape: bf16[128,1152], index: 0, kind: input, shape index: {}]   ;;  %s2039_s1 = inlined_call_operand.hbm [shape: bf16[1152,128], index: 1, kind: input, shape index: {}]   ;;  %s2040_s2 = inlined_call_operand.hbm [shape: f32[1,128], index: 2, kind: input, shape index: {}]   ;;  %s2041_s3 = inlined_call_operand.hbm [shape: bf16[128,128], index: 3, kind: output, shape index: {}]  }
   0x1   :  { %10 = vsyncpa [#allocation4 + $0x1], 0 }
   0x2   :  { %11 = vsyncpa [#allocation7], 0 }
   0x3   :  { %13 = vsyncpa [#allocation7 + $0x1], 0 }
   0x4   :  { %14 = vsyncpa [#allocation5], 0  ;;  %s1757_s12 = smov 0   ;;  %s1759_s13 = smov 0  }
   0x5   :  { %s1761_s14 = smov 0   ;;  %s1763_s15 = smov 0  }
   0x6   :  { %s1765_s16 = smov 0   ;;  %s1767_s17 = smov 0  }
   0x7 LB: > { %s1786_s18 = sadd.s32 4294967295, %s1723_s17   ;;  %s48_s19 = sadd.s32 1, %s1711_s14  ;;  %s1723_s17 = sphi %s1767_s17, %s20_s17   ;;  %s1719_s16 = sphi %s1765_s16, %s2059_s16   ;;  %s1715_s15 = sphi %s1763_s15, %s2058_s15   ;;  %s1711_s14 = sphi %s1761_s14, %s2057_s14   ;;  %s1707_s13 = sphi %s1759_s13, %s2056_s13   ;;  %s1703_s12 = sphi %s1757_s12, %s2055_s12  }
   0x8   : > { %p55_p0 = scmp.ne.s32.totalorder %s1711_s14, %s1707_s13  ;;  %p56_p1 = scmp.eq.s32.totalorder %s1723_s17, 0 }
   0x9   : > { %p61_p2 = scmp.ne.s32.totalorder %s1707_s13, %s1703_s12  ;;  %p2042_p3 = scmp.eq.s32.totalorder %s1786_s18, 0 }
   0xa   : > { %p57_p4 = por %p56_p1, %p55_p0  ;;  %p1147_p5 = scmp.ge.s32.totalorder %s1723_s17, 1 }
   0xb   : > { %p1797_p6 = por %p2042_p3, %p61_p2  ;;  %p154_p7 = scmp.lt.s32.totalorder %s1723_s17, 4 }
   0xc   : > { %s1725_s22 = smov [#allocation8]   ;;  %p1429_p10 = scmp.lt.s32.totalorder %s1723_s17, 3 }
   0xd   : > { %s2046_s20 = scalar_select %p1797_p6, 1, 0 }
   0xe   : > { %p1802_p8 = pnand %p1147_p5, %p154_p7  ;;  %s169_s23 = sshll.u32 %s1725_s22, 4  ;;  %s170_s23 = int_to_ptr.vmem [resolvable:$true] %s169_s23 }
   0xf   : > { %s180_s24 = sand.u32 1, %s1711_s14   ;;  %p1816_p12 = pnand %p1429_p10, %p57_p4 }
  0x10   : > { %s2047_s21 = scalar_select %p1802_p8, 1, 0 }
  0x11   : > { %p1417_p9 = pneg %p1802_p8  ;;  %s1547_s29 = scalar_lea.hbm %s2040_s2, 16 }
  0x12   : > { %s2049_s26 = scalar_select %p1816_p12, 1, 0 }
  0x13   : > { %p1812_p11 = pnand %p1417_p9, %p2042_p3  ;;  %p1548_p13 = scmp.ne.s32.totalorder %s2040_s2, %s1547_s29 }
  0x14   : > { %p1554_p5 = scmp.lt.u32.totalorder %s1547_s29, %s2040_s2 }
  0x15   : > { %p1549_p0 = pneg %p1812_p11 }
  0x17   : > { %p1550_p1 = pnand %p1549_p0, %p1548_p13 }
  0x19   : > { %p1551_p2 = pneg %p1550_p1 }
  0x1b   : > { %p1556_p4 = pnand %p1554_p5, %p1551_p2 }
  0x1d   : > { %1559 = shalt.err (!%p1556_p4)
}
  0x1e   : > { %s1560_s7 = scalar_lea.vmem %s170_s23, 16  ;;  %s1567_s8 = scalar_lea.vmem %s170_s23, 32 }
  0x1f   : > { %p1561_p7 = scmp.ne.s32.totalorder %s170_s23, %s1560_s7  ;;  %p1568_p3 = scmp.lt.s32.totalorder %s170_s23, %s170_s23 }
  0x20   : > { %p1569_p6 = scmp.lt.s32.totalorder %s1567_s8, %s1560_s7 }
  0x21   : > { %p1563_p9 = pnand %p1561_p7, %p1549_p0 }
  0x22   : > { %p1570_p8 = por %p1569_p6, %p1568_p3 }
  0x23   : > { %p1564_p10 = pneg %p1563_p9 }
  0x25   : > { %p1571_p12 = pnand %p1570_p8, %p1564_p10 }
  0x27   : > { %1574 = shalt.err (!%p1571_p12)
}
  0x28   : > { %1420 = dma.hbm_to_vmem [thread:$0]  (!%p1812_p11), %s2040_s2, 16, %s170_s23, [#allocation7]  }
  0x29   : > { %s32_s11 = sadd.s32 1, %s1719_s16  ;;  %s1839_s12 = smul.u32 192, %s180_s24 }
  0x2a   : > { %p33_p3 = scmp.ge.s32.totalorder %s32_s11, 3  ;;  %s1225_s22 = smul.u32 192, %s1719_s16 }
  0x2b   : > { %s184_s23 = scalar_lea.vmem [#allocation3], %s1839_s12  ;;  %s204_s4 = sand.u32 1, %s1723_s17  }
  0x2c   : > { %s2061_s11 = smov (%p33_p3, %s32_s11), 0  ;;  %s1847_s28 = scalar_lea.hbm %s2038_s0, %s1225_s22 }
  0x2d   : > { %s194_s29 = sshll.u32 %s184_s23, 4  ;;  %s44_s30 = ssub.s32 %s1719_s16, %s2061_s11  ;;  %s1852_s29 = int_to_ptr.vmem [resolvable:$true] %s194_s29 }
  0x2e   : > { %p46_p6 = scmp.eq.s32.totalorder %s44_s30, 0  ;;  %s1862_s6 = scalar_lea.sflag [#allocation4], %s180_s24 }
  0x2f   : > { %s1575_s7 = scalar_lea.hbm %s1847_s28, 3072  ;;  %p2050_p11 = scmp.ne.s32.totalorder %s2049_s26, 0 }
  0x30   : > { %s1858_s5 = scalar_select %p46_p6, %s1711_s14, %s48_s19  }
  0x31   : > { %p1576_p8 = scmp.ne.s32.totalorder %s1847_s28, %s1575_s7  ;;  %p1577_p12 = pneg %p2050_p11 }
  0x32   : > { %s1580_s10 = scalar_lea.hbm %s2038_s0, 9216  ;;  %p1581_p1 = scmp.lt.u32.totalorder %s1847_s28, %s2038_s0 }
  0x33   : > { %p1578_p13 = pnand %p1577_p12, %p1576_p8  ;;  %p1582_p2 = scmp.lt.u32.totalorder %s1580_s10, %s1575_s7 }
  0x34   : > { %p1584_p4 = scmp.lt.u32.totalorder %s1575_s7, %s1847_s28 }
  0x35   : > { %p1579_p0 = pneg %p1578_p13  ;;  %p1583_p5 = por %p1582_p2, %p1581_p1 }
  0x37   : > { %p1585_p7 = por %p1584_p4, %p1583_p5 }
  0x39   : > { %p1586_p9 = pnand %p1585_p7, %p1579_p0 }
  0x3b   : > { %1589 = shalt.err (!%p1586_p9)
}
  0x3c   : > { %s1590_s19 = scalar_lea.vmem %s1852_s29, 3072  ;;  %s1726_s24 = smov [#allocation3]  }
  0x3d   : > { %p1591_p10 = scmp.ne.s32.totalorder %s1852_s29, %s1590_s19  ;;  %s1595_s27 = sshll.u32 %s1726_s24, 4  ;;  %s1596_s27 = int_to_ptr.vmem [resolvable:$false] %s1595_s27 }
  0x3e   : > { %s1597_s23 = scalar_lea.vmem %s1596_s27, 6144  ;;  %p1598_p8 = scmp.lt.s32.totalorder %s1852_s29, %s1596_s27 }
  0x3f   : > { %p1593_p3 = pnand %p1591_p10, %p1577_p12  ;;  %p1599_p13 = scmp.lt.s32.totalorder %s1597_s23, %s1590_s19 }
  0x41   : > { %p1594_p6 = pneg %p1593_p3  ;;  %p1600_p1 = por %p1599_p13, %p1598_p8 }
  0x43   : > { %p1601_p2 = pnand %p1600_p1, %p1594_p6 }
  0x45   : > { %1604 = shalt.err (!%p1601_p2)
}
  0x46   : > { %s1727_s30 = smov 576   ;;  %s1728_s7 = smov 192  }
  0x47   : > { %s1729_s8 = smov 12   ;;  %s1226_s9 = smul.u32 3072, %s1719_s16 }
  0x48   : > { %1424 = dma.hbm_to_vmem [thread:$0]  (!%p2050_p11), %s1847_s28, 3072, %s1852_s29, %s1862_s6, %s1727_s30, %s1728_s7, %s1729_s8  }
  0x49   : > { %s208_s10 = scalar_lea.vmem [#allocation6], %s1839_s12  ;;  %s1897_s24 = scalar_lea.hbm %s2039_s1, %s1226_s9 }
  0x4a   : > { %s216_s22 = sshll.u32 %s208_s10, 4  ;;  %s1901_s27 = scalar_lea.sflag [#allocation7], %s204_s4  ;;  %s1892_s22 = int_to_ptr.vmem [resolvable:$true] %s216_s22 }
  0x4b   : > { %s1605_s23 = scalar_lea.hbm %s1897_s24, 3072  ;;  %s1610_s29 = scalar_lea.hbm %s2039_s1, 9216 }
  0x4c   : > { %p1606_p0 = scmp.ne.s32.totalorder %s1897_s24, %s1605_s23  ;;  %p1611_p7 = scmp.lt.u32.totalorder %s1897_s24, %s2039_s1 }
  0x4d   : > { %p1612_p9 = scmp.lt.u32.totalorder %s1610_s29, %s1605_s23  ;;  %p1614_p3 = scmp.lt.u32.totalorder %s1605_s23, %s1897_s24 }
  0x4e   : > { %p1608_p5 = pnand %p1606_p0, %p1577_p12 }
  0x4f   : > { %p1613_p10 = por %p1612_p9, %p1611_p7 }
  0x50   : > { %p1609_p4 = pneg %p1608_p5 }
  0x51   : > { %p1615_p6 = por %p1614_p3, %p1613_p10 }
  0x53   : > { %p1616_p8 = pnand %p1615_p6, %p1609_p4 }
  0x55   : > { %1619 = shalt.err (!%p1616_p8)
}
  0x56   : > { %s1620_s4 = scalar_lea.vmem %s1892_s22, 3072  ;;  %s1730_s7 = smov [#allocation6]  }
  0x57   : > { %p1621_p13 = scmp.ne.s32.totalorder %s1892_s22, %s1620_s4  ;;  %s1625_s8 = sshll.u32 %s1730_s7, 4  ;;  %s1626_s8 = int_to_ptr.vmem [resolvable:$false] %s1625_s8 }
  0x58   : > { %s1627_s9 = scalar_lea.vmem %s1626_s8, 6144  ;;  %p1628_p0 = scmp.lt.s32.totalorder %s1892_s22, %s1626_s8 }
  0x59   : > { %p1623_p1 = pnand %p1621_p13, %p1577_p12  ;;  %p1629_p5 = scmp.lt.s32.totalorder %s1627_s9, %s1620_s4 }
  0x5b   : > { %p1624_p2 = pneg %p1623_p1  ;;  %p1630_p7 = por %p1629_p5, %p1628_p0 }
  0x5d   : > { %p1631_p9 = pnand %p1630_p7, %p1624_p2 }
  0x5f   : > { %1634 = shalt.err (!%p1631_p9)
}
  0x60   : > { %s1731_s10 = smov 64   ;;  %s1732_s25 = smov 4  }
  0x61   : > { %1427 = dma.hbm_to_vmem [thread:$0]  (!%p2050_p11), %s1897_s24, 3072, %s1892_s22, %s1901_s27, %s1731_s10, %s1731_s10, %s1732_s25  }
  0x62   : > { %p2051_p12 = scmp.ne.s32.totalorder %s2047_s21, 0 }
  0x63   : > { %s230_s19 = sand.u32 (!%p2051_p12), 1, %s1707_s13   ;;  %p2052_p4 = scmp.ne.s32.totalorder (!%p2051_p12), %s2046_s20, 0 }
  0x64   : > { %228 = sbr.rel (%p2051_p12) target bundleno = 475 (0x1db), region = 32  ;;  %s231_s12 = scalar_lea.sflag (!%p2051_p12), [#allocation4], %s230_s19 }
  0x65   : > { %s1404_s23 = smul.u32 (!%p2051_p12), 192, %s230_s19 }
  0x67   : > { %s1930_s28 = scalar_lea.vmem (!%p2051_p12), [#allocation3], %s1404_s23 }
  0x6b   : > { %1686 = dma.done.wait (%p2052_p4), %s231_s12, 3072  }
  0x6c   : > { %1688 = vsyncadd (%p2052_p4), %s231_s12, 4294964224  ;;  %s239_s29 = sand.u32 1, %s1786_s18   ;;  %s1937_s22 = scalar_lea.vmem [#allocation6], %s1404_s23 }
  0x6d   : > { %s240_s26 = scalar_lea.sflag [#allocation7], %s239_s29 }
  0x6e   : > { %1690 = dma.done.wait (%p2052_p4), %s240_s26, 3072  }
  0x6f   : > { %1692 = vsyncadd (%p2052_p4), %s240_s26, 4294964224  ;;  %p2053_p11 = scmp.eq.s32.totalorder %s1786_s18, 0 }
  0x71   : > { %1694 = dma.done.wait (%p2053_p11), [#allocation7], 16   ;;  %p2054_p10 = pmov %p2053_p11 }
  0x72   : > { %p1154_p3 = scmp.ne.s32.totalorder %s1715_s15, 0 }
  0x73   : > { %1696 = vsyncadd (%p2054_p10), [#allocation7], 4294967280  ;;  %v1733_v0 = vmov (!%p1154_p3), 0.0  }
  0x74   : > { %278 = sbr.rel (%p1154_p3) target bundleno = 124 (0x7c), region = 48  ;;  %279 = vst [vmem:[#allocation2] sm:$0xff] (!%p1154_p3), %v1733_v0  ;;  %280 = vst [vmem:[#allocation2 + $0x8] sm:$0xff] (!%p1154_p3), %v1733_v0 }
  0x75   : > { %281 = vst [vmem:[#allocation2 + $0x10] sm:$0xff] (!%p1154_p3), %v1733_v0  ;;  %282 = vst [vmem:[#allocation2 + $0x18] sm:$0xff] (!%p1154_p3), %v1733_v0 }
  0x76   : > { %283 = vst [vmem:[#allocation2 + $0x20] sm:$0xff] (!%p1154_p3), %v1733_v0  ;;  %284 = vst [vmem:[#allocation2 + $0x28] sm:$0xff] (!%p1154_p3), %v1733_v0 }
  0x77   : > { %285 = vst [vmem:[#allocation2 + $0x30] sm:$0xff] (!%p1154_p3), %v1733_v0  ;;  %286 = vst [vmem:[#allocation2 + $0x38] sm:$0xff] (!%p1154_p3), %v1733_v0 }
  0x78   : > { %287 = vst [vmem:[#allocation2 + $0x40] sm:$0xff] (!%p1154_p3), %v1733_v0  ;;  %288 = vst [vmem:[#allocation2 + $0x48] sm:$0xff] (!%p1154_p3), %v1733_v0 }
  0x79   : > { %289 = vst [vmem:[#allocation2 + $0x50] sm:$0xff] (!%p1154_p3), %v1733_v0  ;;  %290 = vst [vmem:[#allocation2 + $0x58] sm:$0xff] (!%p1154_p3), %v1733_v0 }
  0x7a   : > { %291 = vst [vmem:[#allocation2 + $0x60] sm:$0xff] (!%p1154_p3), %v1733_v0  ;;  %292 = vst [vmem:[#allocation2 + $0x68] sm:$0xff] (!%p1154_p3), %v1733_v0 }
  0x7b   : > { %293 = vst [vmem:[#allocation2 + $0x70] sm:$0xff] %v1733_v0  ;;  %294 = vst [vmem:[#allocation2 + $0x78] sm:$0xff] %v1733_v0 }
  0x7c PF: > { %v1491_v1 = vld [vmem:[%s1937_s22 + $0x40] sm:$0xff]   ;;  %v1494_v4 = vld [vmem:[%s1937_s22 + $0x48] sm:$0xff]   ;;  %v1497_v7 = vld [vmem:[%s1937_s22 + $0x50] sm:$0xff]   ;;  %p1203_p6 = scmp.ne.s32.totalorder %s1715_s15, 2 }
  0x7d   : > { %v1492_v2 = vld [vmem:[%s1937_s22] sm:$0xff]   ;;  %1290 = vmatprep.subr.bf16.mxu0 %v1491_v1  ;;  %v1495_v5 = vld [vmem:[%s1937_s22 + $0x8] sm:$0xff]   ;;  %v1498_v8 = vld [vmem:[%s1937_s22 + $0x10] sm:$0xff]  }
  0x7e   : > { %v1493_v3 = vld [vmem:[%s1937_s22 + $0x80] sm:$0xff]   ;;  %1291 = vmatpush3.bf16.msra.mxu0 %v1492_v2  ;;  %v1496_v6 = vld [vmem:[%s1937_s22 + $0x88] sm:$0xff]   ;;  %v1499_v9 = vld [vmem:[%s1937_s22 + $0x90] sm:$0xff]  }
  0x7f   : > { %1370 = vmatprep.subr.bf16.mxu1 %v1493_v3  ;;  %1292 = vmatprep.subr.bf16.mxu0 %v1494_v4  ;;  %v1500_v10 = vld [vmem:[%s1937_s22 + $0x58] sm:$0xff]   ;;  %v1503_v13 = vld [vmem:[%s1937_s22 + $0x60] sm:$0xff]   ;;  %v1506_v16 = vld [vmem:[%s1937_s22 + $0x68] sm:$0xff]  }
  0x80   : > { %1371 = vmatpush3.bf16.msra.mxu1 %v1493_v3  ;;  %v1501_v11 = vld [vmem:[%s1937_s22 + $0x18] sm:$0xff]   ;;  %v1505_v14 = vld [vmem:[%s1937_s22 + $0xa0] sm:$0xff]   ;;  %v1508_v17 = vld [vmem:[%s1937_s22 + $0xa8] sm:$0xff]  }
  0x81   : > { %1372 = vmatprep.subr.bf16.mxu1 %v1496_v6  ;;  %v1502_v12 = vld [vmem:[%s1937_s22 + $0x98] sm:$0xff]   ;;  %v1504_v15 = vld [vmem:[%s1937_s22 + $0x20] sm:$0xff]   ;;  %v1507_v18 = vld [vmem:[%s1937_s22 + $0x28] sm:$0xff]  }
  0x82   : > { %1293 = vmatpush3.bf16.msra.mxu0 %v1495_v5  ;;  %v1509_v19 = vld [vmem:[%s1937_s22 + $0x70] sm:$0xff]   ;;  %v1512_v22 = vld [vmem:[%s1937_s22 + $0x78] sm:$0xff]   ;;  %v1515_v27 = vld [vmem:[%s1930_s28] ss:$12 sps:$4 sm:$0xff]  }
  0x83   : > { %1294 = vmatprep.subr.bf16.mxu0 %v1497_v7  ;;  %v1510_v20 = vld [vmem:[%s1937_s22 + $0x30] sm:$0xff]   ;;  %v1514_v23 = vld [vmem:[%s1937_s22 + $0xb8] sm:$0xff]   ;;  %v1519_v29 = vld [vmem:[%s1930_s28 + $0x20] ss:$12 sps:$4 sm:$0xff]  }
  0x84   : > { %1373 = vmatpush3.bf16.msra.mxu1 %v1496_v6  ;;  %v1511_v21 = vld [vmem:[%s1937_s22 + $0xb0] sm:$0xff]   ;;  %v1513_v26 = vld [vmem:[%s1937_s22 + $0x38] sm:$0xff]   ;;  %v1535_v37 = vld [vmem:[%s1930_s28 + $0x80] ss:$12 sps:$4 sm:$0xff]  }
  0x85   : > { %1374 = vmatprep.subr.bf16.mxu1 %v1499_v9  ;;  %v1517_v24 = vld [vmem:[%s1930_s28 + $0x4] ss:$12 sps:$4 sm:$0xff]   ;;  %v1518_v25 = vld [vmem:[%s1930_s28 + $0x8] ss:$12 sps:$4 sm:$0xff]   ;;  %v1528_v36 = vld [vmem:[%s1930_s28 + $0x4c] ss:$12 sps:$4 sm:$0xff]  }
  0x86   : > { %1295 = vmatpush3.bf16.msra.mxu0 %v1498_v8  ;;  %695 = vmatprep.mubr.bf16.mxu0 %v1517_v24  ;;  %v1520_v28 = vld [vmem:[%s1930_s28 + $0x1c] ss:$12 sps:$4 sm:$0xff]   ;;  %v1526_v30 = vld [vmem:[%s1930_s28 + $0x38] ss:$12 sps:$4 sm:$0xff]   ;;  %v1523_v32 = vld [vmem:[%s1930_s28 + $0x34] ss:$12 sps:$4 sm:$0xff]  }
  0x87   : > { %1296 = vmatprep.subr.bf16.mxu0 %v1500_v10  ;;  %1386 = vmatprep.mubr.bf16.mxu1 %v1518_v25  ;;  %v1522_v31 = vld [vmem:[%s1930_s28 + $0x18] ss:$12 sps:$4 sm:$0xff]   ;;  %v1527_v33 = vld [vmem:[%s1930_s28 + $0x50] ss:$12 sps:$4 sm:$0xff]   ;;  %v1534_v34 = vld [vmem:[%s1930_s28 + $0x68] ss:$12 sps:$4 sm:$0xff]  }
  0x88   : > { %1375 = vmatpush3.bf16.msra.mxu1 %v1499_v9  ;;  %v1525_v35 = vld [vmem:[%s1930_s28 + $0x30] ss:$12 sps:$4 sm:$0xff]   ;;  %v1542_v38 = vld [vmem:[%s1930_s28 + $0x98] ss:$12 sps:$4 sm:$0xff]   ;;  %v1530_v39 = vld [vmem:[%s1930_s28 + $0x48] ss:$12 sps:$4 sm:$0xff]  }
  0x89   : > { %1376 = vmatprep.subr.bf16.mxu1 %v1502_v12  ;;  %v1531_v40 = vld [vmem:[%s1930_s28 + $0x64] ss:$12 sps:$4 sm:$0xff]   ;;  %v1533_v42 = vld [vmem:[%s1930_s28 + $0x60] ss:$12 sps:$4 sm:$0xff]   ;;  %v1536_v43 = vld [vmem:[%s1930_s28 + $0x7c] ss:$12 sps:$4 sm:$0xff]  }
  0x8a   : > { %1297 = vmatpush3.bf16.msra.mxu0 %v1501_v11  ;;  %v1543_v41 = vld [vmem:[%s1930_s28 + $0xb0] ss:$12 sps:$4 sm:$0xff]   ;;  %v1538_v44 = vld [vmem:[%s1930_s28 + $0x78] ss:$12 sps:$4 sm:$0xff]   ;;  %v1539_v45 = vld [vmem:[%s1930_s28 + $0x94] ss:$12 sps:$4 sm:$0xff]  }
  0x8b   : > { %1298 = vmatprep.subr.bf16.mxu0 %v1503_v13  ;;  %v1541_v46 = vld [vmem:[%s1930_s28 + $0x90] ss:$12 sps:$4 sm:$0xff]   ;;  %v1544_v47 = vld [vmem:[%s1930_s28 + $0xac] ss:$12 sps:$4 sm:$0xff]   ;;  %v1546_v48 = vld [vmem:[%s1930_s28 + $0xa8] ss:$12 sps:$4 sm:$0xff]  }
  0x8c   : > { %1377 = vmatpush3.bf16.msra.mxu1 %v1502_v12  ;;  %v295_v55 = vld [vmem:[#allocation2] sm:$0xff]  ;;  %v296_v60 = vld [vmem:[#allocation2 + $0x8] sm:$0xff]  ;;  %v297_v6 = vld [vmem:[#allocation2 + $0x10] sm:$0xff] }
  0x8d   : > { %1378 = vmatprep.subr.bf16.mxu1 %v1505_v14  ;;  %v298_v12 = vld [vmem:[#allocation2 + $0x18] sm:$0xff] }
  0x8e   : > { %1299 = vmatpush3.bf16.msra.mxu0 %v1504_v15 }
  0x8f   : > { %1300 = vmatprep.subr.bf16.mxu0 %v1506_v16 }
  0x90   : > { %1379 = vmatpush3.bf16.msra.mxu1 %v1505_v14 }
  0x91   : > { %1380 = vmatprep.subr.bf16.mxu1 %v1508_v17 }
  0x92   : > { %1301 = vmatpush3.bf16.msra.mxu0 %v1507_v18 }
  0x93   : > { %1302 = vmatprep.subr.bf16.mxu0 %v1509_v19 }
  0x94   : > { %1381 = vmatpush3.bf16.msra.mxu1 %v1508_v17 }
  0x95   : > { %1382 = vmatprep.subr.bf16.mxu1 %v1511_v21 }
  0x96   : > { %1303 = vmatpush3.bf16.msra.mxu0 %v1510_v20 }
  0x97   : > { %1304 = vmatprep.subr.bf16.mxu0 %v1512_v22 }
  0x98   : > { %1383 = vmatpush3.bf16.msra.mxu1 %v1511_v21 }
  0x99   : > { %1384 = vmatprep.subr.bf16.mxu1 %v1514_v23 }
  0x9a   : > { %1305 = vmatpush3.bf16.msra.mxu0 %v1513_v26 }
  0x9c   : > { %1385 = vmatpush3.bf16.msra.mxu1 %v1514_v23  ;;  %v299_v23 = vld [vmem:[#allocation2 + $0x20] sm:$0xff] }
  0x9d   : > { %696 = vmatmul.mubr.bf16.vlgmr.msra.gmra.mrb[0].mxu0 %v1515_v27 }
  0x9e   : > { %703 = vmatprep.mubr.bf16.mxu0 %v1520_v28  ;;  %v300_v28 = vld [vmem:[#allocation2 + $0x28] sm:$0xff] }
  0x9f   : > { %1387 = vmatmul.mubr.bf16.vlgmr.msra.gmra.mrb[0].mxu1 %v1519_v29 }
  0xa0   : > { %1390 = vmatprep.mubr.bf16.mxu1 %v1526_v30 }
  0xa5   : > { %704 = vmatmul.mubr.bf16.gmra.mrb[4].mxu0 %v1522_v31 }
  0xa6   : > { %711 = vmatprep.mubr.bf16.mxu0 %v1523_v32 }
  0xa7   : > { %1391 = vmatmul.mubr.bf16.gmra.mrb[4].mxu1 %v1527_v33 }
  0xa8   : > { %1394 = vmatprep.mubr.bf16.mxu1 %v1534_v34 }
  0xad   : > { %712 = vmatmul.mubr.bf16.gmra.mrb[8].mxu0 %v1525_v35 }
  0xae   : > { %719 = vmatprep.mubr.bf16.mxu0 %v1528_v36 }
  0xaf   : > { %1395 = vmatmul.mubr.bf16.gmra.mrb[8].mxu1 %v1535_v37 }
  0xb0   : > { %1398 = vmatprep.mubr.bf16.mxu1 %v1542_v38  ;;  %v301_v38 = vld [vmem:[#allocation2 + $0x30] sm:$0xff] }
  0xb5   : > { %720 = vmatmul.mubr.bf16.gmra.mrb[12].mxu0 %v1530_v39 }
  0xb6   : > { %727 = vmatprep.mubr.bf16.mxu0 %v1531_v40 }
  0xb7   : > { %1399 = vmatmul.mubr.bf16.gmra.mrb[12].mxu1 %v1543_v41 }
  0xbd   : > { %728 = vmatmul.mubr.bf16.gmra.mrb[16].mxu0 %v1533_v42 }
  0xbe   : > { %735 = vmatprep.mubr.bf16.mxu0 %v1536_v43 }
  0xc5   : > { %736 = vmatmul.mubr.bf16.gmra.mrb[20].mxu0 %v1538_v44  ;;  %v302_v44 = vld [vmem:[#allocation2 + $0x38] sm:$0xff] }
  0xc6   : > { %743 = vmatprep.mubr.bf16.mxu0 %v1539_v45 }
  0xcd   : > { %744 = vmatmul.mubr.bf16.gmra.mrb[24].mxu0 %v1541_v46 }
  0xce   : > { %751 = vmatprep.mubr.bf16.mxu0 %v1544_v47 }
  0xd5   : > { %752 = vmatmul.mubr.bf16.gmra.mrb[28].mxu0 %v1546_v48 }
 0x170   : > { %v1306_v49 = vpop.f32.mrb[0].mxu0 }
 0x171   : > { %v1307_v50 = vpop.f32.mrb[1].mxu0 }
 0x172   : > { %v1308_v51 = vadd.f32 %v1307_v50, %v1306_v49  ;;  %v1309_v52 = vpop.f32.mrb[2].mxu0  ;;  %v1388_v53 = vpop.f32.mrb[0].mxu1 }
 0x173   : > { %v1310_v54 = vpop.f32.mrb[3].mxu0  ;;  %v794_v56 = vpop.f32.mrb[1].mxu1 }
 0x174   : > { %v1311_v57 = vadd.f32 %v1310_v54, %v1309_v52  ;;  %v795_v58 = vadd.f32 %v1308_v51, %v794_v56  ;;  %v1389_v59 = vpop.f32.mrb[2].mxu1  ;;  %v303_v54 = vld [vmem:[#allocation2 + $0x40] sm:$0xff] }
 0x175   : > { %v797_v61 = vpop.f32.mrb[3].mxu1 }
 0x176   : > { %v857_v62 = vadd.f32 %v795_v58, %v295_v55  ;;  %v798_v63 = vadd.f32 %v1311_v57, %v797_v61  ;;  %v304_v57 = vld [vmem:[#allocation2 + $0x48] sm:$0xff] }
 0x178   : > { %873 = vst [vmem:[#allocation2] sm:$0xff] %v857_v62  ;;  %v858_v0 = vadd.f32 %v798_v63, %v296_v60  ;;  %v1312_v1 = vpop.f32.mrb[4].mxu0 }
 0x179   : > { %v1313_v2 = vpop.f32.mrb[5].mxu0 }
 0x17a   : > { %874 = vst [vmem:[#allocation2 + $0x8] sm:$0xff] %v858_v0  ;;  %v1314_v3 = vadd.f32 %v1313_v2, %v1312_v1  ;;  %v1315_v4 = vpop.f32.mrb[6].mxu0  ;;  %v1392_v5 = vpop.f32.mrb[4].mxu1  ;;  %v305_v1 = vld [vmem:[#allocation2 + $0x50] sm:$0xff] }
 0x17b   : > { %v1316_v7 = vpop.f32.mrb[7].mxu0  ;;  %v810_v8 = vpop.f32.mrb[5].mxu1 }
 0x17c   : > { %v803_v9 = vadd.f32 %v1388_v53, %v1314_v3  ;;  %v1317_v10 = vadd.f32 %v1316_v7, %v1315_v4  ;;  %v1393_v11 = vpop.f32.mrb[6].mxu1 }
 0x17d   : > { %v813_v13 = vpop.f32.mrb[7].mxu1 }
 0x17e   : > { %v859_v14 = vadd.f32 %v803_v9, %v297_v6  ;;  %v806_v15 = vadd.f32 %v1389_v59, %v1317_v10 }
 0x180   : > { %875 = vst [vmem:[#allocation2 + $0x10] sm:$0xff] %v859_v14  ;;  %v860_v16 = vadd.f32 %v806_v15, %v298_v12  ;;  %v1318_v17 = vpop.f32.mrb[8].mxu0  ;;  %v307_v14 = vld [vmem:[#allocation2 + $0x60] sm:$0xff] }
 0x181   : > { %v1319_v18 = vpop.f32.mrb[9].mxu0 }
 0x182   : > { %876 = vst [vmem:[#allocation2 + $0x18] sm:$0xff] %v860_v16  ;;  %v1320_v19 = vadd.f32 %v1319_v18, %v1318_v17  ;;  %v1321_v20 = vpop.f32.mrb[10].mxu0  ;;  %v1396_v21 = vpop.f32.mrb[8].mxu1  ;;  %v308_v17 = vld [vmem:[#allocation2 + $0x68] sm:$0xff] }
 0x183   : > { %v1322_v22 = vpop.f32.mrb[11].mxu0  ;;  %v826_v24 = vpop.f32.mrb[9].mxu1 }
 0x184   : > { %v1323_v25 = vadd.f32 %v1322_v22, %v1321_v20  ;;  %v811_v26 = vadd.f32 %v1320_v19, %v810_v8  ;;  %v1397_v27 = vpop.f32.mrb[10].mxu1 }
 0x185   : > { %v829_v29 = vpop.f32.mrb[11].mxu1 }
 0x186   : > { %v861_v30 = vadd.f32 %v811_v26, %v299_v23  ;;  %v814_v31 = vadd.f32 %v1323_v25, %v813_v13  ;;  %v309_v25 = vld [vmem:[#allocation2 + $0x70] sm:$0xff] }
 0x188   : > { %877 = vst [vmem:[#allocation2 + $0x20] sm:$0xff] %v861_v30  ;;  %v862_v32 = vadd.f32 %v814_v31, %v300_v28  ;;  %v1324_v33 = vpop.f32.mrb[12].mxu0 }
 0x189   : > { %v1325_v34 = vpop.f32.mrb[13].mxu0 }
 0x18a   : > { %878 = vst [vmem:[#allocation2 + $0x28] sm:$0xff] %v862_v32  ;;  %v1326_v35 = vadd.f32 %v1325_v34, %v1324_v33  ;;  %v1327_v36 = vpop.f32.mrb[14].mxu0  ;;  %v1400_v37 = vpop.f32.mrb[12].mxu1  ;;  %v893_v33 = vld [vmem:[#allocation2] sm:$0xff] (!%p1203_p6)  ;;  %v894_v34 = vld [vmem:[#allocation2 + $0x8] sm:$0xff] (!%p1203_p6) }
 0x18b   : > { %v1328_v39 = vpop.f32.mrb[15].mxu0  ;;  %v842_v40 = vpop.f32.mrb[13].mxu1 }
 0x18c   : > { %v819_v41 = vadd.f32 %v1392_v5, %v1326_v35  ;;  %v1329_v42 = vadd.f32 %v1328_v39, %v1327_v36  ;;  %v1401_v43 = vpop.f32.mrb[14].mxu1  ;;  %v306_v5 = vld [vmem:[#allocation2 + $0x58] sm:$0xff]  ;;  %v1204_v35 = vld [vmem:[#allocation8] ss:$0 sm:$0xff] (!%p1203_p6)  ;;  %v895_v39 = vld [vmem:[#allocation2 + $0x10] sm:$0xff] (!%p1203_p6) }
 0x18d   : > { %v845_v45 = vpop.f32.mrb[15].mxu1  ;;  %v916_v36 = vadd.f32 (!%p1203_p6), %v1204_v35, %v893_v33 }
 0x18e   : > { %v863_v46 = vadd.f32 %v819_v41, %v301_v38  ;;  %v822_v47 = vadd.f32 %v1393_v11, %v1329_v42  ;;  %v917_v38 = vadd.f32 (!%p1203_p6), %v1204_v35, %v894_v34  ;;  %v918_v42 = vadd.f32 (!%p1203_p6), %v1204_v35, %v895_v39 }
 0x18f   : > { %v897_v41 = vld [vmem:[#allocation2 + $0x20] sm:$0xff] (!%p1203_p6) }
 0x190   : > { %879 = vst [vmem:[#allocation2 + $0x30] sm:$0xff] %v863_v46  ;;  %v864_v48 = vadd.f32 %v822_v47, %v302_v44  ;;  %v1330_v49 = vpop.f32.mrb[16].mxu0  ;;  %v932_v47 = vmax.f32 (!%p1203_p6), %v916_v36, 0.0 }
 0x191   : > { %v1331_v50 = vpop.f32.mrb[17].mxu0  ;;  %v898_v44 = vld [vmem:[#allocation2 + $0x28] sm:$0xff] (!%p1203_p6) }
 0x192   : > { %880 = vst [vmem:[#allocation2 + $0x38] sm:$0xff] %v864_v48  ;;  %v1332_v51 = vadd.f32 %v1331_v50, %v1330_v49  ;;  %v1333_v52 = vpop.f32.mrb[18].mxu0  ;;  %v933_v48 = vmax.f32 (!%p1203_p6), %v917_v38, 0.0  ;;  %v921_v49 = vadd.f32 (!%p1203_p6), %v1204_v35, %v898_v44 }
 0x193   : > { %v1334_v53 = vpop.f32.mrb[19].mxu0 }
 0x194   : > { %v1335_v55 = vadd.f32 %v1334_v53, %v1333_v52  ;;  %v827_v56 = vadd.f32 %v1332_v51, %v826_v24 }
 0x196   : > { %v865_v58 = vadd.f32 %v827_v56, %v303_v54  ;;  %v830_v59 = vadd.f32 %v1335_v55, %v829_v29  ;;  %v310_v29 = vld [vmem:[#allocation2 + $0x78] sm:$0xff]  ;;  %v934_v54 = vmax.f32 (!%p1203_p6), %v918_v42, 0.0 }
 0x197   : > { %v899_v46 = vld [vmem:[#allocation2 + $0x30] sm:$0xff] (!%p1203_p6) }
 0x198   : > { %881 = vst [vmem:[#allocation2 + $0x40] sm:$0xff] %v865_v58  ;;  %v866_v60 = vadd.f32 %v830_v59, %v304_v57  ;;  %v1336_v61 = vpop.f32.mrb[20].mxu0  ;;  %v922_v50 = vadd.f32 (!%p1203_p6), %v1204_v35, %v899_v46 }
 0x199   : > { %v1337_v62 = vpop.f32.mrb[21].mxu0 }
 0x19a   : > { %882 = vst [vmem:[#allocation2 + $0x48] sm:$0xff] %v866_v60  ;;  %v1338_v63 = vadd.f32 %v1337_v62, %v1336_v61  ;;  %v1339_v0 = vpop.f32.mrb[22].mxu0  ;;  %v1246_v60 = vpack.c.bf16 (!%p1203_p6), %v933_v48, %v932_v47  ;;  %v937_v61 = vmax.f32 (!%p1203_p6), %v921_v49, 0.0  ;;  %v938_v62 = vmax.f32 (!%p1203_p6), %v922_v50, 0.0 }
 0x19b   : > { %v1340_v2 = vpop.f32.mrb[23].mxu0 }
 0x19c   : > { %v835_v3 = vadd.f32 %v1396_v21, %v1338_v63  ;;  %v1341_v4 = vadd.f32 %v1340_v2, %v1339_v0  ;;  %1247 = vst [vmem:[#allocation9] sm:$0xff] (!%p1203_p6), %v1246_v60  }
 0x19e   : > { %v867_v6 = vadd.f32 %v835_v3, %v305_v1  ;;  %v838_v7 = vadd.f32 %v1397_v27, %v1341_v4 }
 0x19f   : > { %v901_v51 = vld [vmem:[#allocation2 + $0x40] sm:$0xff] (!%p1203_p6) }
 0x1a0   : > { %883 = vst [vmem:[#allocation2 + $0x50] sm:$0xff] %v867_v6  ;;  %v868_v8 = vadd.f32 %v838_v7, %v306_v5  ;;  %v1342_v9 = vpop.f32.mrb[24].mxu0  ;;  %v924_v63 = vadd.f32 (!%p1203_p6), %v1204_v35, %v901_v51 }
 0x1a1   : > { %v1343_v10 = vpop.f32.mrb[25].mxu0  ;;  %v902_v52 = vld [vmem:[#allocation2 + $0x48] sm:$0xff] (!%p1203_p6) }
 0x1a2   : > { %884 = vst [vmem:[#allocation2 + $0x58] sm:$0xff] %v868_v8  ;;  %v1344_v11 = vadd.f32 %v1343_v10, %v1342_v9  ;;  %v1345_v12 = vpop.f32.mrb[26].mxu0  ;;  %v925_v3 = vadd.f32 (!%p1203_p6), %v1204_v35, %v902_v52  ;;  %v940_v8 = vmax.f32 (!%p1203_p6), %v924_v63, 0.0 }
 0x1a3   : > { %v1346_v13 = vpop.f32.mrb[27].mxu0 }
 0x1a4   : > { %v1347_v15 = vadd.f32 %v1346_v13, %v1345_v12  ;;  %v843_v16 = vadd.f32 %v1344_v11, %v842_v40  ;;  %v896_v40 = vld [vmem:[#allocation2 + $0x18] sm:$0xff] (!%p1203_p6)  ;;  %v941_v12 = vmax.f32 (!%p1203_p6), %v925_v3, 0.0 }
 0x1a6   : > { %v869_v18 = vadd.f32 %v843_v16, %v307_v14  ;;  %v846_v19 = vadd.f32 %v1347_v15, %v845_v45  ;;  %v920_v45 = vadd.f32 (!%p1203_p6), %v1204_v35, %v897_v41 }
 0x1a7   : > { %v903_v53 = vld [vmem:[#allocation2 + $0x50] sm:$0xff] (!%p1203_p6) }
 0x1a8   : > { %885 = vst [vmem:[#allocation2 + $0x60] sm:$0xff] %v869_v18  ;;  %v870_v20 = vadd.f32 %v846_v19, %v308_v17  ;;  %v1348_v21 = vpop.f32.mrb[28].mxu0  ;;  %v936_v56 = vmax.f32 (!%p1203_p6), %v920_v45, 0.0  ;;  %v926_v4 = vadd.f32 (!%p1203_p6), %v1204_v35, %v903_v53  ;;  %v1266_v19 = vpack.c.bf16 (!%p1203_p6), %v941_v12, %v940_v8 }
 0x1a9   : > { %v1349_v22 = vpop.f32.mrb[29].mxu0  ;;  %v904_v58 = vld [vmem:[#allocation2 + $0x58] sm:$0xff] (!%p1203_p6) }
 0x1aa   : > { %886 = vst [vmem:[#allocation2 + $0x68] sm:$0xff] %v870_v20  ;;  %v1350_v23 = vadd.f32 %v1349_v22, %v1348_v21  ;;  %v1351_v24 = vpop.f32.mrb[30].mxu0  ;;  %v1256_v7 = vpack.c.bf16 (!%p1203_p6), %v937_v61, %v936_v56  ;;  %v927_v9 = vadd.f32 (!%p1203_p6), %v1204_v35, %v904_v58  ;;  %v942_v13 = vmax.f32 (!%p1203_p6), %v926_v4, 0.0  ;;  %1286 = vst [vmem:[#allocation9 + $0x20] sm:$0xff] (!%p1203_p6), %v1266_v19  }
 0x1ab   : > { %v1352_v26 = vpop.f32.mrb[31].mxu0 }
 0x1ac   : > { %v851_v27 = vadd.f32 %v1400_v37, %v1350_v23  ;;  %v1353_v28 = vadd.f32 %v1352_v26, %v1351_v24  ;;  %892 = sbr.rel (%p1203_p6) target bundleno = 449 (0x1c1), region = 52  ;;  %v919_v37 = vadd.f32 (!%p1203_p6), %v1204_v35, %v896_v40  ;;  %1284 = vst [vmem:[#allocation9 + $0x10] sm:$0xff] (!%p1203_p6), %v1256_v7   ;;  %v943_v15 = vmax.f32 (!%p1203_p6), %v927_v9, 0.0 }
 0x1ae   : > { %v871_v30 = vadd.f32 %v851_v27, %v309_v25  ;;  %v854_v31 = vadd.f32 %v1401_v43, %v1353_v28  ;;  %v900_v43 = vld [vmem:[#allocation2 + $0x38] sm:$0xff] (!%p1203_p6)  ;;  %v935_v55 = vmax.f32 (!%p1203_p6), %v919_v37, 0.0  ;;  %v1271_v21 = vpack.c.bf16 (!%p1203_p6), %v943_v15, %v942_v13 }
 0x1af   : > { %v923_v57 = vadd.f32 (!%p1203_p6), %v1204_v35, %v900_v43  ;;  %v905_v59 = vld [vmem:[#allocation2 + $0x60] sm:$0xff] (!%p1203_p6) }
 0x1b0   : > { %887 = vst [vmem:[#allocation2 + $0x70] sm:$0xff] %v871_v30  ;;  %v872_v32 = vadd.f32 %v854_v31, %v310_v29  ;;  %v1251_v1 = vpack.c.bf16 (!%p1203_p6), %v935_v55, %v934_v54  ;;  %v928_v10 = vadd.f32 (!%p1203_p6), %v1204_v35, %v905_v59  ;;  %1287 = vst [vmem:[#allocation9 + $0x28] sm:$0xff] (!%p1203_p6), %v1271_v21  }
 0x1b1   : > { %v906_v0 = vld [vmem:[#allocation2 + $0x68] sm:$0xff] (!%p1203_p6)  ;;  %v939_v2 = vmax.f32 (!%p1203_p6), %v923_v57, 0.0 }
 0x1b2   : > { %888 = vst [vmem:[#allocation2 + $0x78] sm:$0xff] %v872_v32  ;;  %1283 = vst [vmem:[#allocation9 + $0x8] sm:$0xff] (!%p1203_p6), %v1251_v1   ;;  %v929_v14 = vadd.f32 (!%p1203_p6), %v1204_v35, %v906_v0  ;;  %v944_v16 = vmax.f32 (!%p1203_p6), %v928_v10, 0.0 }
 0x1b3   : > { %v1261_v11 = vpack.c.bf16 %v939_v2, %v938_v62 }
 0x1b4   : > { %v945_v20 = vmax.f32 %v929_v14, 0.0 }
 0x1b5   : > { %1285 = vst [vmem:[#allocation9 + $0x18] sm:$0xff] %v1261_v11  }
 0x1b6   : > { %v1276_v24 = vpack.c.bf16 %v945_v20, %v944_v16 }
 0x1b7   : > { %v907_v5 = vld [vmem:[#allocation2 + $0x70] sm:$0xff] }
 0x1b8   : > { %v930_v17 = vadd.f32 %v1204_v35, %v907_v5  ;;  %1288 = vst [vmem:[#allocation9 + $0x30] sm:$0xff] %v1276_v24  }
 0x1b9   : > { %v908_v6 = vld [vmem:[#allocation2 + $0x78] sm:$0xff] }
 0x1ba   : > { %v931_v18 = vadd.f32 %v1204_v35, %v908_v6  ;;  %v946_v22 = vmax.f32 %v930_v17, 0.0 }
 0x1bc   : > { %v947_v23 = vmax.f32 %v931_v18, 0.0 }
 0x1be   : > { %v1281_v25 = vpack.c.bf16 %v947_v23, %v946_v22 }
 0x1c0   : > { %1289 = vst [vmem:[#allocation9 + $0x38] sm:$0xff] %v1281_v25  }
 0x1c1 PF: > { %p1431_p8 = scmp.eq.s32.totalorder %s1786_s18, 2  ;;  %s1734_s15 = smov [#allocation9]  }
 0x1c2   : > { %s1038_s20 = sshll.u32 %s1734_s15, 4  ;;  %s1039_s20 = int_to_ptr.vmem [resolvable:$true] %s1038_s20 }
 0x1c3   : > { %s1635_s21 = scalar_lea.vmem %s1039_s20, 1024  ;;  %p1642_p0 = scmp.lt.s32.totalorder %s1039_s20, %s1039_s20 }
 0x1c4   : > { %p1636_p13 = scmp.ne.s32.totalorder %s1039_s20, %s1635_s21  ;;  %p1643_p5 = scmp.lt.s32.totalorder %s1635_s21, %s1635_s21 }
 0x1c6   : > { %p1637_p1 = pnand %p1636_p13, %p1431_p8  ;;  %p1644_p7 = por %p1643_p5, %p1642_p0 }
 0x1c8   : > { %p1638_p2 = pneg %p1637_p1 }
 0x1ca   : > { %p1645_p9 = pnand %p1644_p7, %p1638_p2 }
 0x1cc   : > { %1648 = shalt.err (!%p1645_p9)
}
 0x1cd   : > { %s1649_s6 = scalar_lea.hbm %s2041_s3, 1024 }
 0x1ce   : > { %p1650_p12 = scmp.ne.s32.totalorder %s2041_s3, %s1649_s6  ;;  %p1655_p10 = scmp.lt.u32.totalorder %s1649_s6, %s2041_s3 }
 0x1d0   : > { %p1651_p4 = pnand %p1650_p12, %p1431_p8 }
 0x1d2   : > { %p1652_p11 = pneg %p1651_p4 }
 0x1d4   : > { %p1657_p3 = pnand %p1655_p10, %p1652_p11 }
 0x1d6   : > { %1660 = shalt.err (!%p1657_p3)
}
 0x1d7   : > { %s1735_s9 = smov 64   ;;  %s1736_s10 = smov 4  }
 0x1d8   : > { %1414 = dma.vmem_to_hbm [thread:$0]  (%p1431_p8), %s1039_s20, 1024, %s2041_s3, [#allocation5], %s1735_s9, %s1735_s9, %s1736_s10  }
 0x1d9   : > { %1698 = dma.done.wait (%p1431_p8), [#allocation5], 1024  }
 0x1da   : > { %1700 = vsyncadd (%p1431_p8), [#allocation5], 4294966272 }
 0x1db PF: > { %s20_s17 = sadd.s32 1, %s1723_s17   ;;  %s2055_s12 = smov %s1707_s13 }
 0x1dc   : > { %p17_p6 = scmp.ge.s32.totalorder %s20_s17, 5   ;;  %s2056_s13 = smov %s1711_s14 }
 0x1dd   : > { %s2057_s14 = smov %s1858_s5  ;;  %s2058_s15 = smov %s1719_s16 }
 0x1de   : > { %s2059_s16 = smov %s2061_s11  ;;  %19 = sbr.rel (!%p17_p6) target bundleno = 7 (0x7), region = 96 }
 0x1e5   :  { %1054 = vsyncpa [#allocation4], 1 }
 0x1e6   :  { %1056 = vsyncpa [#allocation4 + $0x1], 1 }
 0x1e7   :  { %1057 = vsyncpa [#allocation7], 1 }
 0x1e8   :  { %1059 = vsyncpa [#allocation7 + $0x1], 1 }
 0x1e9   :  { %1060 = vsyncpa [#allocation5], 1 }
 0x1ea   :  { %1062 = vsyncpa [#allocation5 + $0x1], 1 }

// kernel: depthnet_forward.7
= control target key start
LH: loop header
LB: loop body
LE: loop exit
PB: predicated region body
PF: predicated region fallthrough
CT: control target
= control target key end

     0   :  { %s1697_s0 = inlined_call_operand.hbm [shape: bf16[32,1152], index: 0, kind: input, shape index: {}]   ;;  %s1698_s1 = inlined_call_operand.hbm [shape: bf16[1152,256], index: 1, kind: input, shape index: {}]   ;;  %s1699_s2 = inlined_call_operand.hbm [shape: f32[1,256], index: 2, kind: input, shape index: {}]   ;;  %s1700_s3 = inlined_call_operand.hbm [shape: bf16[32,256], index: 3, kind: output, shape index: {}]  }
   0x1   :  { %1705 = sst [smem:[#allocation14_spill]] %s1697_s0 }
   0x2   :  { %8 = vsyncpa [#allocation4], 0 }
   0x3   :  { %10 = vsyncpa [#allocation4 + $0x1], 0 }
   0x4   :  { %11 = vsyncpa [#allocation7], 0 }
   0x5   :  { %13 = vsyncpa [#allocation7 + $0x1], 0 }
   0x6   :  { %14 = vsyncpa [#allocation5], 0  ;;  %s1412_s12 = smov 0   ;;  %s1414_s13 = smov 0  }
   0x7   :  { %s1416_s14 = smov 0   ;;  %s1418_s15 = smov 0  }
   0x8   :  { %s1420_s16 = smov 0   ;;  %s1422_s17 = smov 0  }
   0x9 LB: > { %s1441_s18 = sadd.s32 4294967295, %s1377_s17   ;;  %s48_s19 = sadd.s32 1, %s1365_s14  ;;  %s1377_s17 = sphi %s1422_s17, %s20_s17   ;;  %s1373_s16 = sphi %s1420_s16, %s1720_s16   ;;  %s1369_s15 = sphi %s1418_s15, %s1719_s15   ;;  %s1365_s14 = sphi %s1416_s14, %s1718_s14   ;;  %s1361_s13 = sphi %s1414_s13, %s1717_s13   ;;  %s1357_s12 = sphi %s1412_s12, %s1716_s12  }
   0xa   : > { %p55_p0 = scmp.ne.s32.totalorder %s1365_s14, %s1361_s13  ;;  %p56_p1 = scmp.eq.s32.totalorder %s1377_s17, 0 }
   0xb   : > { %p61_p2 = scmp.ne.s32.totalorder %s1361_s13, %s1357_s12  ;;  %p1701_p3 = scmp.eq.s32.totalorder %s1441_s18, 0 }
   0xc   : > { %p57_p4 = por %p56_p1, %p55_p0  ;;  %p942_p5 = scmp.ge.s32.totalorder %s1377_s17, 1 }
   0xd   : > { %p1452_p6 = por %p1701_p3, %p61_p2  ;;  %p154_p7 = scmp.lt.s32.totalorder %s1377_s17, 4 }
   0xe   : > { %s1379_s22 = smov [#allocation8]   ;;  %p1058_p10 = scmp.lt.s32.totalorder %s1377_s17, 3 }
   0xf   : > { %s1706_s20 = scalar_select %p1452_p6, 1, 0 }
  0x10   : > { %p1457_p8 = pnand %p942_p5, %p154_p7  ;;  %s170_s23 = sshll.u32 %s1379_s22, 4  ;;  %s171_s23 = int_to_ptr.vmem [resolvable:$true] %s170_s23 }
  0x11   : > { %s1465_s24 = sand.u32 1, %s1365_s14   ;;  %p1473_p12 = pnand %p1058_p10, %p57_p4 }
  0x12   : > { %s1707_s21 = scalar_select %p1457_p8, 1, 0 }
  0x13   : > { %p1046_p9 = pneg %p1457_p8  ;;  %s1201_s29 = scalar_lea.hbm %s1699_s2, 32 }
  0x14   : > { %s1709_s26 = scalar_select %p1473_p12, 1, 0 }
  0x15   : > { %p1469_p11 = pnand %p1046_p9, %p1701_p3  ;;  %p1202_p13 = scmp.ne.s32.totalorder %s1699_s2, %s1201_s29 }
  0x16   : > { %p1208_p5 = scmp.lt.u32.totalorder %s1201_s29, %s1699_s2 }
  0x17   : > { %p1203_p0 = pneg %p1469_p11 }
  0x19   : > { %p1204_p1 = pnand %p1203_p0, %p1202_p13 }
  0x1b   : > { %p1205_p2 = pneg %p1204_p1 }
  0x1d   : > { %p1210_p4 = pnand %p1208_p5, %p1205_p2 }
  0x1f   : > { %1213 = shalt.err (!%p1210_p4)
}
  0x20   : > { %s1214_s7 = scalar_lea.vmem %s171_s23, 32  ;;  %p1222_p3 = scmp.lt.s32.totalorder %s171_s23, %s171_s23 }
  0x21   : > { %p1215_p7 = scmp.ne.s32.totalorder %s171_s23, %s1214_s7  ;;  %p1223_p6 = scmp.lt.s32.totalorder %s1214_s7, %s1214_s7 }
  0x23   : > { %p1217_p9 = pnand %p1215_p7, %p1203_p0  ;;  %p1224_p8 = por %p1223_p6, %p1222_p3 }
  0x25   : > { %p1218_p10 = pneg %p1217_p9 }
  0x27   : > { %p1225_p12 = pnand %p1224_p8, %p1218_p10 }
  0x29   : > { %1228 = shalt.err (!%p1225_p12)
}
  0x2a   : > { %1049 = dma.hbm_to_vmem [thread:$0]  (!%p1469_p11), %s1699_s2, 32, %s171_s23, [#allocation7]  }
  0x2b   : > { %s32_s10 = sadd.s32 1, %s1373_s16  ;;  %s1030_s11 = smul.u32 48, %s1465_s24 }
  0x2c   : > { %p33_p3 = scmp.ge.s32.totalorder %s32_s10, 3  ;;  %s1014_s12 = smul.u32 192, %s1373_s16 }
  0x2d   : > { %s1710_s0 = sld [smem:[#allocation14_spill]]  ;;  %s185_s28 = scalar_lea.vmem [#allocation3], %s1030_s11 }
  0x2e   : > { %s1722_s10 = smov (%p33_p3, %s32_s10), 0  ;;  %s195_s29 = sshll.u32 %s185_s28, 4  ;;  %s1505_s29 = int_to_ptr.vmem [resolvable:$true] %s195_s29 }
  0x2f   : > { %s44_s23 = ssub.s32 %s1373_s16, %s1722_s10  ;;  %s205_s30 = sand.u32 1, %s1377_s17  }
  0x30   : > { %p46_p6 = scmp.eq.s32.totalorder %s44_s23, 0  ;;  %s182_s5 = scalar_lea.sflag [#allocation4], %s1465_s24 }
  0x31   : > { %p1711_p11 = scmp.ne.s32.totalorder %s1709_s26, 0 }
  0x32   : > { %s1511_s4 = scalar_select %p46_p6, %s1365_s14, %s48_s19  }
  0x33   : > { %s1501_s27 = scalar_lea.hbm %s1710_s0, %s1014_s12  ;;  %p1231_p12 = pneg %p1711_p11 }
  0x34   : > { %s1229_s6 = scalar_lea.hbm %s1501_s27, 768  ;;  %s1234_s9 = scalar_lea.hbm %s1710_s0, 2304 }
  0x35   : > { %p1230_p8 = scmp.ne.s32.totalorder %s1501_s27, %s1229_s6  ;;  %p1235_p1 = scmp.lt.u32.totalorder %s1501_s27, %s1710_s0 }
  0x36   : > { %p1236_p2 = scmp.lt.u32.totalorder %s1234_s9, %s1229_s6  ;;  %p1238_p4 = scmp.lt.u32.totalorder %s1229_s6, %s1501_s27 }
  0x37   : > { %p1232_p13 = pnand %p1231_p12, %p1230_p8 }
  0x38   : > { %p1237_p5 = por %p1236_p2, %p1235_p1 }
  0x39   : > { %p1233_p0 = pneg %p1232_p13 }
  0x3a   : > { %p1239_p7 = por %p1238_p4, %p1237_p5 }
  0x3c   : > { %p1240_p9 = pnand %p1239_p7, %p1233_p0 }
  0x3e   : > { %1243 = shalt.err (!%p1240_p9)
}
  0x3f   : > { %s1244_s19 = scalar_lea.vmem %s1505_s29, 768  ;;  %s1380_s22 = smov [#allocation3]  }
  0x40   : > { %p1245_p10 = scmp.ne.s32.totalorder %s1505_s29, %s1244_s19  ;;  %s1249_s25 = sshll.u32 %s1380_s22, 4  ;;  %s1250_s25 = int_to_ptr.vmem [resolvable:$false] %s1249_s25 }
  0x41   : > { %s1251_s28 = scalar_lea.vmem %s1250_s25, 1536  ;;  %p1252_p8 = scmp.lt.s32.totalorder %s1505_s29, %s1250_s25 }
  0x42   : > { %p1247_p3 = pnand %p1245_p10, %p1231_p12  ;;  %p1253_p13 = scmp.lt.s32.totalorder %s1251_s28, %s1244_s19 }
  0x44   : > { %p1248_p6 = pneg %p1247_p3  ;;  %p1254_p1 = por %p1253_p13, %p1252_p8 }
  0x46   : > { %p1255_p2 = pnand %p1254_p1, %p1248_p6 }
  0x48   : > { %1258 = shalt.err (!%p1255_p2)
}
  0x49   : > { %s1381_s23 = smov 576   ;;  %s1382_s6 = smov 192  }
  0x4a   : > { %s1383_s7 = smov 12   ;;  %s1031_s8 = smul.u32 384, %s1465_s24 }
  0x4b   : > { %1053 = dma.hbm_to_vmem [thread:$0]  (!%p1711_p11), %s1501_s27, 768, %s1505_s29, %s182_s5, %s1381_s23, %s1382_s6, %s1383_s7  }
  0x4c   : > { %s1021_s9 = smul.u32 6144, %s1373_s16  ;;  %s209_s22 = scalar_lea.vmem [#allocation6], %s1031_s8 }
  0x4d   : > { %s219_s25 = sshll.u32 %s209_s22, 4  ;;  %s1552_s28 = scalar_lea.sflag [#allocation7], %s205_s30  ;;  %s1548_s25 = int_to_ptr.vmem [resolvable:$true] %s219_s25 }
  0x4e   : > { %s1546_s19 = scalar_lea.hbm %s1698_s1, %s1021_s9  ;;  %s1264_s29 = scalar_lea.hbm %s1698_s1, 18432 }
  0x4f   : > { %s1259_s0 = scalar_lea.hbm %s1546_s19, 6144  ;;  %p1265_p7 = scmp.lt.u32.totalorder %s1546_s19, %s1698_s1 }
  0x50   : > { %p1260_p0 = scmp.ne.s32.totalorder %s1546_s19, %s1259_s0  ;;  %p1266_p9 = scmp.lt.u32.totalorder %s1264_s29, %s1259_s0 }
  0x51   : > { %p1268_p3 = scmp.lt.u32.totalorder %s1259_s0, %s1546_s19 }
  0x52   : > { %p1262_p5 = pnand %p1260_p0, %p1231_p12  ;;  %p1267_p10 = por %p1266_p9, %p1265_p7 }
  0x54   : > { %p1263_p4 = pneg %p1262_p5  ;;  %p1269_p6 = por %p1268_p3, %p1267_p10 }
  0x56   : > { %p1270_p8 = pnand %p1269_p6, %p1263_p4 }
  0x58   : > { %1273 = shalt.err (!%p1270_p8)
}
  0x59   : > { %s1274_s30 = scalar_lea.vmem %s1548_s25, 6144  ;;  %s1384_s6 = smov [#allocation6]  }
  0x5a   : > { %p1275_p13 = scmp.ne.s32.totalorder %s1548_s25, %s1274_s30  ;;  %s1279_s7 = sshll.u32 %s1384_s6, 4  ;;  %s1280_s7 = int_to_ptr.vmem [resolvable:$false] %s1279_s7 }
  0x5b   : > { %s1281_s8 = scalar_lea.vmem %s1280_s7, 12288  ;;  %p1282_p0 = scmp.lt.s32.totalorder %s1548_s25, %s1280_s7 }
  0x5c   : > { %p1277_p1 = pnand %p1275_p13, %p1231_p12  ;;  %p1283_p5 = scmp.lt.s32.totalorder %s1281_s8, %s1274_s30 }
  0x5e   : > { %p1278_p2 = pneg %p1277_p1  ;;  %p1284_p7 = por %p1283_p5, %p1282_p0 }
  0x60   : > { %p1285_p9 = pnand %p1284_p7, %p1278_p2 }
  0x62   : > { %1288 = shalt.err (!%p1285_p9)
}
  0x63   : > { %s1385_s0 = smov 128   ;;  %s1386_s9 = smov 8  }
  0x64   : > { %1056 = dma.hbm_to_vmem [thread:$0]  (!%p1711_p11), %s1546_s19, 6144, %s1548_s25, %s1552_s28, %s1385_s0, %s1385_s0, %s1386_s9  }
  0x65   : > { %p1712_p12 = scmp.ne.s32.totalorder %s1707_s21, 0 }
  0x66   : > { %s233_s11 = sand.u32 (!%p1712_p12), 1, %s1361_s13   ;;  %p1713_p4 = scmp.ne.s32.totalorder (!%p1712_p12), %s1706_s20, 0 }
  0x67   : > { %231 = sbr.rel (%p1712_p12) target bundleno = 460 (0x1cc), region = 32  ;;  %s234_s22 = scalar_lea.sflag (!%p1712_p12), [#allocation4], %s233_s11 }
  0x68   : > { %s1032_s12 = smul.u32 (!%p1712_p12), 48, %s233_s11 }
  0x6a   : > { %s1581_s24 = scalar_lea.vmem (!%p1712_p12), [#allocation3], %s1032_s12 }
  0x6e   : > { %1340 = dma.done.wait (%p1713_p4), %s234_s22, 768  }
  0x6f   : > { %1342 = vsyncadd (%p1713_p4), %s234_s22, 4294966528  ;;  %s242_s27 = sand.u32 1, %s1441_s18   ;;  %s1033_s26 = smul.u32 384, %s233_s11 }
  0x70   : > { %s243_s19 = scalar_lea.sflag [#allocation7], %s242_s27 }
  0x71   : > { %s1588_s25 = scalar_lea.vmem [#allocation6], %s1033_s26 }
  0x72   : > { %1344 = dma.done.wait (%p1713_p4), %s243_s19, 6144  }
  0x73   : > { %1346 = vsyncadd (%p1713_p4), %s243_s19, 4294961152  ;;  %p1714_p11 = scmp.eq.s32.totalorder %s1441_s18, 0 }
  0x75   : > { %1348 = dma.done.wait (%p1714_p11), [#allocation7], 32   ;;  %p1715_p10 = pmov %p1714_p11 }
  0x76   : > { %p950_p3 = scmp.ne.s32.totalorder %s1369_s15, 0 }
  0x77   : > { %1350 = vsyncadd (%p1715_p10), [#allocation7], 4294967264  ;;  %v1387_v0 = vmov (!%p950_p3), 0.0  }
  0x78   : > { %284 = sbr.rel (%p950_p3) target bundleno = 127 (0x7f), region = 48  ;;  %285 = vst [vmem:[#allocation2] sm:$0xff] (!%p950_p3), %v1387_v0  ;;  %286 = vst [vmem:[#allocation2 + $0x8] sm:$0xff] (!%p950_p3), %v1387_v0 }
  0x79   : > { %287 = vst [vmem:[#allocation2 + $0x10] sm:$0xff] (!%p950_p3), %v1387_v0  ;;  %288 = vst [vmem:[#allocation2 + $0x18] sm:$0xff] (!%p950_p3), %v1387_v0 }
  0x7a   : > { %289 = vst [vmem:[#allocation2 + $0x20] sm:$0xff] (!%p950_p3), %v1387_v0  ;;  %290 = vst [vmem:[#allocation2 + $0x28] sm:$0xff] (!%p950_p3), %v1387_v0 }
  0x7b   : > { %291 = vst [vmem:[#allocation2 + $0x30] sm:$0xff] (!%p950_p3), %v1387_v0  ;;  %292 = vst [vmem:[#allocation2 + $0x38] sm:$0xff] (!%p950_p3), %v1387_v0 }
  0x7f PF: > { %v1121_v1 = vld [vmem:[%s1588_s25 + $0x4] ss:$8 sps:$4 sm:$0xff]   ;;  %v1123_v2 = vld [vmem:[%s1588_s25] ss:$8 sps:$4 sm:$0xff]   ;;  %v1388_v3 = vmov 0   ;;  %p1005_p6 = scmp.ne.s32.totalorder %s1369_s15, 2 }
  0x80   : > { %714 = vmatprep.mubr.bf16.mxu0 %v1388_v3  ;;  %629 = vmatprep.subr.bf16.mxu1 %v1121_v1  ;;  %v1124_v4 = vld [vmem:[%s1588_s25 + $0x14] ss:$8 sps:$4 sm:$0xff]   ;;  %v1126_v5 = vld [vmem:[%s1588_s25 + $0x10] ss:$8 sps:$4 sm:$0xff]   ;;  %v1127_v6 = vld [vmem:[%s1588_s25 + $0x24] ss:$8 sps:$4 sm:$0xff]  }
  0x81   : > { %630 = vmatpush1.bf16.msra.mxu1 %v1123_v2  ;;  %v1129_v7 = vld [vmem:[%s1588_s25 + $0x20] ss:$8 sps:$4 sm:$0xff]   ;;  %v1130_v8 = vld [vmem:[%s1588_s25 + $0x34] ss:$8 sps:$4 sm:$0xff]   ;;  %v1132_v9 = vld [vmem:[%s1588_s25 + $0x30] ss:$8 sps:$4 sm:$0xff]  }
  0x82   : > { %631 = vmatprep.subr.bf16.mxu1 %v1124_v4  ;;  %v1145_v10 = vld [vmem:[%s1588_s25 + $0x104] ss:$8 sps:$4 sm:$0xff]   ;;  %v1147_v11 = vld [vmem:[%s1588_s25 + $0x100] ss:$8 sps:$4 sm:$0xff]   ;;  %v1151_v13 = vld [vmem:[%s1588_s25 + $0x114] ss:$8 sps:$4 sm:$0xff]  }
  0x83   : > { %v1133_v12 = vld [vmem:[%s1588_s25 + $0x44] ss:$8 sps:$4 sm:$0xff]   ;;  %682 = vmatprep.subr.bf16.mxu0 %v1145_v10  ;;  %v1153_v14 = vld [vmem:[%s1588_s25 + $0x110] ss:$8 sps:$4 sm:$0xff]   ;;  %v1135_v15 = vld [vmem:[%s1588_s25 + $0x40] ss:$8 sps:$4 sm:$0xff]  }
  0x84   : > { %683 = vmatpush1.bf16.msra.mxu0 %v1147_v11  ;;  %v1136_v16 = vld [vmem:[%s1588_s25 + $0x54] ss:$8 sps:$4 sm:$0xff]   ;;  %v1157_v17 = vld [vmem:[%s1588_s25 + $0x124] ss:$8 sps:$4 sm:$0xff]   ;;  %v1159_v18 = vld [vmem:[%s1588_s25 + $0x120] ss:$8 sps:$4 sm:$0xff]  }
  0x85   : > { %632 = vmatpush1.bf16.msra.mxu1 %v1126_v5  ;;  %684 = vmatprep.subr.bf16.mxu0 %v1151_v13  ;;  %v1138_v19 = vld [vmem:[%s1588_s25 + $0x50] ss:$8 sps:$4 sm:$0xff]   ;;  %v1163_v20 = vld [vmem:[%s1588_s25 + $0x134] ss:$8 sps:$4 sm:$0xff]   ;;  %v1139_v21 = vld [vmem:[%s1588_s25 + $0x64] ss:$8 sps:$4 sm:$0xff]  }
  0x86   : > { %633 = vmatprep.subr.bf16.mxu1 %v1127_v6  ;;  %v1165_v22 = vld [vmem:[%s1588_s25 + $0x130] ss:$8 sps:$4 sm:$0xff]   ;;  %v1141_v23 = vld [vmem:[%s1588_s25 + $0x60] ss:$8 sps:$4 sm:$0xff]   ;;  %v1169_v24 = vld [vmem:[%s1588_s25 + $0x144] ss:$8 sps:$4 sm:$0xff]  }
  0x87   : > { %v1142_v25 = vld [vmem:[%s1588_s25 + $0x74] ss:$8 sps:$4 sm:$0xff]   ;;  %v1171_v26 = vld [vmem:[%s1588_s25 + $0x140] ss:$8 sps:$4 sm:$0xff]   ;;  %v1144_v27 = vld [vmem:[%s1588_s25 + $0x70] ss:$8 sps:$4 sm:$0xff]  }
  0x88   : > { %685 = vmatpush1.bf16.msra.mxu0 %v1153_v14  ;;  %v1175_v28 = vld [vmem:[%s1588_s25 + $0x154] ss:$8 sps:$4 sm:$0xff]   ;;  %v1148_v29 = vld [vmem:[%s1588_s25 + $0x84] ss:$8 sps:$4 sm:$0xff]   ;;  %v1177_v30 = vld [vmem:[%s1588_s25 + $0x150] ss:$8 sps:$4 sm:$0xff]  }
  0x89   : > { %634 = vmatpush1.bf16.msra.mxu1 %v1129_v7  ;;  %686 = vmatprep.subr.bf16.mxu0 %v1157_v17  ;;  %v1150_v31 = vld [vmem:[%s1588_s25 + $0x80] ss:$8 sps:$4 sm:$0xff]   ;;  %v1181_v32 = vld [vmem:[%s1588_s25 + $0x164] ss:$8 sps:$4 sm:$0xff]   ;;  %v1154_v33 = vld [vmem:[%s1588_s25 + $0x94] ss:$8 sps:$4 sm:$0xff]  }
  0x8a   : > { %635 = vmatprep.subr.bf16.mxu1 %v1130_v8  ;;  %v1156_v34 = vld [vmem:[%s1588_s25 + $0x90] ss:$8 sps:$4 sm:$0xff]   ;;  %v1183_v35 = vld [vmem:[%s1588_s25 + $0x160] ss:$8 sps:$4 sm:$0xff]   ;;  %v1187_v37 = vld [vmem:[%s1588_s25 + $0x174] ss:$8 sps:$4 sm:$0xff]  }
  0x8b   : > { %v1196_v36 = vld [vmem:[%s1581_s24 + $0x4] ss:$12 sps:$4 sm:$0xff]   ;;  %v1193_v42 = vld [vmem:[%s1581_s24 + $0x8] ss:$12 sps:$4 sm:$0xff]   ;;  %v1197_v47 = vld [vmem:[%s1581_s24 + $0x20] ss:$12 sps:$4 sm:$0xff]  }
  0x8c   : > { %687 = vmatpush1.bf16.msra.mxu0 %v1159_v18  ;;  %v1160_v38 = vld [vmem:[%s1588_s25 + $0xa4] ss:$8 sps:$4 sm:$0xff]   ;;  %661 = vmatprep.mubr.bf16.mxu1 %v1196_v36  ;;  %v1189_v39 = vld [vmem:[%s1588_s25 + $0x170] ss:$8 sps:$4 sm:$0xff]   ;;  %v1162_v40 = vld [vmem:[%s1588_s25 + $0xa0] ss:$8 sps:$4 sm:$0xff]  }
  0x8d   : > { %636 = vmatpush1.bf16.msra.mxu1 %v1132_v9  ;;  %688 = vmatprep.subr.bf16.mxu0 %v1163_v20  ;;  %v1166_v41 = vld [vmem:[%s1588_s25 + $0xb4] ss:$8 sps:$4 sm:$0xff]   ;;  %v1168_v43 = vld [vmem:[%s1588_s25 + $0xb0] ss:$8 sps:$4 sm:$0xff]   ;;  %v1172_v44 = vld [vmem:[%s1588_s25 + $0xc4] ss:$8 sps:$4 sm:$0xff]  }
  0x8e   : > { %637 = vmatprep.subr.bf16.mxu1 %v1133_v12  ;;  %v1174_v45 = vld [vmem:[%s1588_s25 + $0xc0] ss:$8 sps:$4 sm:$0xff]   ;;  %v1178_v46 = vld [vmem:[%s1588_s25 + $0xd4] ss:$8 sps:$4 sm:$0xff]   ;;  %v1180_v48 = vld [vmem:[%s1588_s25 + $0xd0] ss:$8 sps:$4 sm:$0xff]  }
  0x8f   : > { %v1184_v49 = vld [vmem:[%s1588_s25 + $0xe4] ss:$8 sps:$4 sm:$0xff]   ;;  %v1186_v50 = vld [vmem:[%s1588_s25 + $0xe0] ss:$8 sps:$4 sm:$0xff]   ;;  %v1190_v51 = vld [vmem:[%s1588_s25 + $0xf4] ss:$8 sps:$4 sm:$0xff]  }
  0x90   : > { %689 = vmatpush1.bf16.msra.mxu0 %v1165_v22  ;;  %v1192_v52 = vld [vmem:[%s1588_s25 + $0xf0] ss:$8 sps:$4 sm:$0xff]   ;;  %v293_v0 = vld [vmem:[#allocation2] sm:$0xff] }
  0x91   : > { %638 = vmatpush1.bf16.msra.mxu1 %v1135_v15  ;;  %690 = vmatprep.subr.bf16.mxu0 %v1169_v24  ;;  %v1194_v53 = vld [vmem:[%s1581_s24] ss:$12 sps:$4 sm:$0xff]   ;;  %v1198_v54 = vld [vmem:[%s1581_s24 + $0x1c] ss:$12 sps:$4 sm:$0xff]   ;;  %v1200_v55 = vld [vmem:[%s1581_s24 + $0x18] ss:$12 sps:$4 sm:$0xff]  }
  0x92   : > { %639 = vmatprep.subr.bf16.mxu1 %v1136_v16  ;;  %v295_v6 = vld [vmem:[#allocation2 + $0x10] sm:$0xff]  ;;  %v296_v10 = vld [vmem:[#allocation2 + $0x18] sm:$0xff]  ;;  %v297_v16 = vld [vmem:[#allocation2 + $0x20] sm:$0xff] }
  0x93   : > { %v299_v22 = vld [vmem:[#allocation2 + $0x30] sm:$0xff] }
  0x94   : > { %691 = vmatpush1.bf16.msra.mxu0 %v1171_v26  ;;  %v300_v26 = vld [vmem:[#allocation2 + $0x38] sm:$0xff] }
  0x95   : > { %640 = vmatpush1.bf16.msra.mxu1 %v1138_v19  ;;  %692 = vmatprep.subr.bf16.mxu0 %v1175_v28  ;;  %v298_v19 = vld [vmem:[#allocation2 + $0x28] sm:$0xff] }
  0x96   : > { %641 = vmatprep.subr.bf16.mxu1 %v1139_v21 }
  0x98   : > { %693 = vmatpush1.bf16.msra.mxu0 %v1177_v30 }
  0x99   : > { %642 = vmatpush1.bf16.msra.mxu1 %v1141_v23  ;;  %694 = vmatprep.subr.bf16.mxu0 %v1181_v32  ;;  %v765_v32 = vlaneseq (!%p1005_p6) }
  0x9a   : > { %643 = vmatprep.subr.bf16.mxu1 %v1142_v25 }
  0x9c   : > { %695 = vmatpush1.bf16.msra.mxu0 %v1183_v35 }
  0x9d   : > { %644 = vmatpush1.bf16.msra.mxu1 %v1144_v27  ;;  %696 = vmatprep.subr.bf16.mxu0 %v1187_v37 }
  0x9e   : > { %645 = vmatprep.subr.bf16.mxu1 %v1148_v29 }
  0xa0   : > { %697 = vmatpush1.bf16.msra.mxu0 %v1189_v39 }
  0xa1   : > { %646 = vmatpush1.bf16.msra.mxu1 %v1150_v31 }
  0xa2   : > { %647 = vmatprep.subr.bf16.mxu1 %v1154_v33  ;;  %v766_v33 = vshrl.u32 (!%p1005_p6), %v765_v32, 7 }
  0xa3   : > { %715 = vmatmul.mubr.bf16.vlgmr.msra.gmra.mrb[0].mxu0 %v1193_v42 }
  0xa4   : > { %724 = vmatprep.mubr.bf16.mxu0 %v1388_v3  ;;  %v294_v3 = vld [vmem:[#allocation2 + $0x8] sm:$0xff]  ;;  %v767_v37 = vsub.s32 (!%p1005_p6), 0, %v766_v33 }
  0xa5   : > { %648 = vmatpush1.bf16.msra.mxu1 %v1156_v34  ;;  %v763_v34 = vld [vmem:[#allocation8] sm:$0x3] (!%p1005_p6) }
  0xa6   : > { %649 = vmatprep.subr.bf16.mxu1 %v1160_v38  ;;  %v771_v38 = vsub.s32 (!%p1005_p6), 1, %v766_v33  ;;  %v768_v42 = vrot.slane (!%p1005_p6), %v763_v34, %v767_v37 }
  0xa9   : > { %650 = vmatpush1.bf16.msra.mxu1 %v1162_v40 }
  0xaa   : > { %651 = vmatprep.subr.bf16.mxu1 %v1166_v41 }
  0xab   : > { %725 = vmatmul.mubr.bf16.gmra.mrb[4].mxu0 %v1197_v47 }
  0xad   : > { %652 = vmatpush1.bf16.msra.mxu1 %v1168_v43  ;;  %v772_v43 = vrot.slane (!%p1005_p6), %v763_v34, %v771_v38 }
  0xae   : > { %653 = vmatprep.subr.bf16.mxu1 %v1172_v44 }
  0xb1   : > { %654 = vmatpush1.bf16.msra.mxu1 %v1174_v45 }
  0xb2   : > { %655 = vmatprep.subr.bf16.mxu1 %v1178_v46 }
  0xb5   : > { %656 = vmatpush1.bf16.msra.mxu1 %v1180_v48 }
  0xb6   : > { %657 = vmatprep.subr.bf16.mxu1 %v1184_v49 }
  0xb9   : > { %658 = vmatpush1.bf16.msra.mxu1 %v1186_v50 }
  0xba   : > { %659 = vmatprep.subr.bf16.mxu1 %v1190_v51 }
  0xbd   : > { %660 = vmatpush1.bf16.msra.mxu1 %v1192_v52 }
  0xc0   : > { %662 = vmatmul.mubr.bf16.vlgmr.msra.gmra.mrb[0].mxu1 %v1194_v53 }
  0xc1   : > { %671 = vmatprep.mubr.bf16.mxu1 %v1198_v54 }
  0xc8   : > { %672 = vmatmul.mubr.bf16.gmra.mrb[4].mxu1 %v1200_v55 }
 0x176   : > { %v716_v56 = vpop.f32.mrb[0].mxu0 }
 0x177   : > { %v718_v57 = vpop.f32.mrb[1].mxu0 }
 0x178   : > { %v720_v58 = vpop.f32.mrb[2].mxu0 }
 0x179   : > { %v722_v59 = vpop.f32.mrb[3].mxu0 }
 0x17e   : > { %v726_v60 = vpop.f32.mrb[4].mxu0 }
 0x17f   : > { %v728_v61 = vpop.f32.mrb[5].mxu0 }
 0x180   : > { %v730_v62 = vpop.f32.mrb[6].mxu0 }
 0x181   : > { %v732_v63 = vpop.f32.mrb[7].mxu0 }
 0x193   : > { %v663_v1 = vpop.f32.mrb[0].mxu1 }
 0x194   : > { %v717_v2 = vadd.f32 %v716_v56, %v663_v1  ;;  %v665_v4 = vpop.f32.mrb[1].mxu1 }
 0x195   : > { %v719_v5 = vadd.f32 %v718_v57, %v665_v4  ;;  %v667_v7 = vpop.f32.mrb[2].mxu1 }
 0x196   : > { %v735_v8 = vadd.f32 %v717_v2, %v293_v0  ;;  %v721_v9 = vadd.f32 %v720_v58, %v667_v7  ;;  %v669_v11 = vpop.f32.mrb[3].mxu1 }
 0x197   : > { %v736_v12 = vadd.f32 %v719_v5, %v294_v3  ;;  %v723_v13 = vadd.f32 %v722_v59, %v669_v11 }
 0x198   : > { %743 = vst [vmem:[#allocation2] sm:$0xff] %v735_v8  ;;  %v737_v14 = vadd.f32 %v721_v9, %v295_v6 }
 0x199   : > { %744 = vst [vmem:[#allocation2 + $0x8] sm:$0xff] %v736_v12  ;;  %v738_v15 = vadd.f32 %v723_v13, %v296_v10 }
 0x19a   : > { %745 = vst [vmem:[#allocation2 + $0x10] sm:$0xff] %v737_v14 }
 0x19b   : > { %746 = vst [vmem:[#allocation2 + $0x18] sm:$0xff] %v738_v15  ;;  %v673_v17 = vpop.f32.mrb[4].mxu1 }
 0x19c   : > { %v727_v18 = vadd.f32 %v726_v60, %v673_v17  ;;  %v675_v20 = vpop.f32.mrb[5].mxu1 }
 0x19d   : > { %v729_v21 = vadd.f32 %v728_v61, %v675_v20  ;;  %v677_v23 = vpop.f32.mrb[6].mxu1  ;;  %754 = sbr.rel (%p1005_p6) target bundleno = 434 (0x1b2), region = 52 }
 0x19e   : > { %v739_v24 = vadd.f32 %v727_v18, %v297_v16  ;;  %v731_v25 = vadd.f32 %v730_v62, %v677_v23  ;;  %v679_v27 = vpop.f32.mrb[7].mxu1 }
 0x19f   : > { %v740_v28 = vadd.f32 %v729_v21, %v298_v19  ;;  %v733_v29 = vadd.f32 %v732_v63, %v679_v27  ;;  %v755_v35 = vld [vmem:[#allocation2] sm:$0xff] (!%p1005_p6) }
 0x1a0   : > { %747 = vst [vmem:[#allocation2 + $0x20] sm:$0xff] %v739_v24  ;;  %v741_v30 = vadd.f32 %v731_v25, %v299_v22  ;;  %v756_v36 = vld [vmem:[#allocation2 + $0x8] sm:$0xff] (!%p1005_p6)  ;;  %v775_v47 = vadd.f32 (!%p1005_p6), %v768_v42, %v755_v35 }
 0x1a1   : > { %748 = vst [vmem:[#allocation2 + $0x28] sm:$0xff] %v740_v28  ;;  %v742_v31 = vadd.f32 %v733_v29, %v300_v26  ;;  %v757_v39 = vld [vmem:[#allocation2 + $0x10] sm:$0xff] (!%p1005_p6)  ;;  %v776_v48 = vadd.f32 (!%p1005_p6), %v772_v43, %v756_v36 }
 0x1a2   : > { %749 = vst [vmem:[#allocation2 + $0x30] sm:$0xff] %v741_v30  ;;  %v758_v40 = vld [vmem:[#allocation2 + $0x18] sm:$0xff] (!%p1005_p6)  ;;  %v777_v49 = vadd.f32 (!%p1005_p6), %v768_v42, %v757_v39  ;;  %v783_v55 = vmax.f32 (!%p1005_p6), %v775_v47, 0.0 }
 0x1a3   : > { %750 = vst [vmem:[#allocation2 + $0x38] sm:$0xff] %v742_v31  ;;  %v778_v50 = vadd.f32 (!%p1005_p6), %v772_v43, %v758_v40  ;;  %v784_v56 = vmax.f32 (!%p1005_p6), %v776_v48, 0.0 }
 0x1a4   : > { %v785_v57 = vmax.f32 %v777_v49, 0.0 }
 0x1a5   : > { %v786_v58 = vmax.f32 %v778_v50, 0.0  ;;  %v1017_v63 = vpack.c.bf16 %v784_v56, %v783_v55 }
 0x1a7   : > { %v759_v41 = vld [vmem:[#allocation2 + $0x20] sm:$0xff]  ;;  %v1018_v0 = vpack.c.bf16 %v786_v58, %v785_v57  ;;  %815 = vst [vmem:[#allocation9] sm:$0xff] %v1017_v63 }
 0x1a8   : > { %v760_v44 = vld [vmem:[#allocation2 + $0x28] sm:$0xff]  ;;  %v779_v51 = vadd.f32 %v768_v42, %v759_v41 }
 0x1a9   : > { %v761_v45 = vld [vmem:[#allocation2 + $0x30] sm:$0xff]  ;;  %v780_v52 = vadd.f32 %v772_v43, %v760_v44  ;;  %816 = vst [vmem:[#allocation9 + $0x8] sm:$0xff] %v1018_v0 }
 0x1aa   : > { %v762_v46 = vld [vmem:[#allocation2 + $0x38] sm:$0xff]  ;;  %v781_v53 = vadd.f32 %v768_v42, %v761_v45  ;;  %v787_v59 = vmax.f32 %v779_v51, 0.0 }
 0x1ab   : > { %v782_v54 = vadd.f32 %v772_v43, %v762_v46  ;;  %v788_v60 = vmax.f32 %v780_v52, 0.0 }
 0x1ac   : > { %v789_v61 = vmax.f32 %v781_v53, 0.0 }
 0x1ad   : > { %v790_v62 = vmax.f32 %v782_v54, 0.0  ;;  %v1019_v1 = vpack.c.bf16 %v788_v60, %v787_v59 }
 0x1af   : > { %v1020_v2 = vpack.c.bf16 %v790_v62, %v789_v61  ;;  %817 = vst [vmem:[#allocation9 + $0x10] sm:$0xff] %v1019_v1 }
 0x1b1   : > { %818 = vst [vmem:[#allocation9 + $0x18] sm:$0xff] %v1020_v2 }
 0x1b2 PF: > { %p1060_p8 = scmp.eq.s32.totalorder %s1441_s18, 2  ;;  %s1389_s15 = smov [#allocation9]  }
 0x1b3   : > { %s831_s20 = sshll.u32 %s1389_s15, 4  ;;  %s832_s20 = int_to_ptr.vmem [resolvable:$true] %s831_s20 }
 0x1b4   : > { %s1289_s21 = scalar_lea.vmem %s832_s20, 512  ;;  %p1296_p0 = scmp.lt.s32.totalorder %s832_s20, %s832_s20 }
 0x1b5   : > { %p1290_p13 = scmp.ne.s32.totalorder %s832_s20, %s1289_s21  ;;  %p1297_p5 = scmp.lt.s32.totalorder %s1289_s21, %s1289_s21 }
 0x1b7   : > { %p1291_p1 = pnand %p1290_p13, %p1060_p8  ;;  %p1298_p7 = por %p1297_p5, %p1296_p0 }
 0x1b9   : > { %p1292_p2 = pneg %p1291_p1 }
 0x1bb   : > { %p1299_p9 = pnand %p1298_p7, %p1292_p2 }
 0x1bd   : > { %1302 = shalt.err (!%p1299_p9)
}
 0x1be   : > { %s1303_s5 = scalar_lea.hbm %s1700_s3, 512 }
 0x1bf   : > { %p1304_p12 = scmp.ne.s32.totalorder %s1700_s3, %s1303_s5  ;;  %p1309_p10 = scmp.lt.u32.totalorder %s1303_s5, %s1700_s3 }
 0x1c1   : > { %p1305_p4 = pnand %p1304_p12, %p1060_p8 }
 0x1c3   : > { %p1306_p11 = pneg %p1305_p4 }
 0x1c5   : > { %p1311_p3 = pnand %p1309_p10, %p1306_p11 }
 0x1c7   : > { %1314 = shalt.err (!%p1311_p3)
}
 0x1c8   : > { %s1390_s8 = smov 128   ;;  %s1391_s0 = smov 8  }
 0x1c9   : > { %1043 = dma.vmem_to_hbm [thread:$0]  (%p1060_p8), %s832_s20, 512, %s1700_s3, [#allocation5], %s1390_s8, %s1390_s8, %s1391_s0  }
 0x1ca   : > { %1352 = dma.done.wait (%p1060_p8), [#allocation5], 512  }
 0x1cb   : > { %1354 = vsyncadd (%p1060_p8), [#allocation5], 4294966784 }
 0x1cc PF: > { %s20_s17 = sadd.s32 1, %s1377_s17   ;;  %s1716_s12 = smov %s1361_s13 }
 0x1cd   : > { %p17_p6 = scmp.ge.s32.totalorder %s20_s17, 5   ;;  %s1717_s13 = smov %s1365_s14 }
 0x1ce   : > { %s1718_s14 = smov %s1511_s4  ;;  %s1719_s15 = smov %s1373_s16 }
 0x1cf   : > { %s1720_s16 = smov %s1722_s10  ;;  %19 = sbr.rel (!%p17_p6) target bundleno = 9 (0x9), region = 96 }
 0x1d6   :  { %847 = vsyncpa [#allocation4], 1 }
 0x1d7   :  { %849 = vsyncpa [#allocation4 + $0x1], 1 }
 0x1d8   :  { %850 = vsyncpa [#allocation7], 1 }
 0x1d9   :  { %852 = vsyncpa [#allocation7 + $0x1], 1 }
 0x1da   :  { %853 = vsyncpa [#allocation5], 1 }
 0x1db   :  { %855 = vsyncpa [#allocation5 + $0x1], 1 }

// kernel: depthnet_forward.8
= control target key start
LH: loop header
LB: loop body
LE: loop exit
PB: predicated region body
PF: predicated region fallthrough
CT: control target
= control target key end

     0   :  { %8 = vsyncpa [#allocation4], 0  ;;  %s1556_s0 = inlined_call_operand.hbm [shape: bf16[8,2304], index: 0, kind: input, shape index: {}]   ;;  %s1557_s1 = inlined_call_operand.hbm [shape: bf16[2304,256], index: 1, kind: input, shape index: {}]   ;;  %s1558_s2 = inlined_call_operand.hbm [shape: f32[1,256], index: 2, kind: input, shape index: {}]   ;;  %s1559_s3 = inlined_call_operand.hbm [shape: bf16[8,256], index: 3, kind: output, shape index: {}]  }
   0x1   :  { %10 = vsyncpa [#allocation4 + $0x1], 0 }
   0x2   :  { %11 = vsyncpa [#allocation7], 0 }
   0x3   :  { %13 = vsyncpa [#allocation7 + $0x1], 0 }
   0x4   :  { %14 = vsyncpa [#allocation5], 0  ;;  %s1260_s12 = smov 0   ;;  %s1262_s13 = smov 0  }
   0x5   :  { %s1264_s14 = smov 0   ;;  %s1266_s15 = smov 0  }
   0x6   :  { %s1268_s16 = smov 0   ;;  %s1270_s17 = smov 0  }
   0x7 LB: > { %s1289_s18 = sadd.s32 4294967295, %s1230_s17   ;;  %s48_s19 = sadd.s32 1, %s1218_s14  ;;  %s1230_s17 = sphi %s1270_s17, %s20_s17   ;;  %s1226_s16 = sphi %s1268_s16, %s1580_s16   ;;  %s1222_s15 = sphi %s1266_s15, %s1579_s15   ;;  %s1218_s14 = sphi %s1264_s14, %s1578_s14   ;;  %s1214_s13 = sphi %s1262_s13, %s1577_s13   ;;  %s1210_s12 = sphi %s1260_s12, %s1576_s12  }
   0x8   : > { %p55_p0 = scmp.ne.s32.totalorder %s1218_s14, %s1214_s13  ;;  %p61_p1 = scmp.ne.s32.totalorder %s1214_s13, %s1210_s12 }
   0x9   : > { %p1560_p2 = scmp.eq.s32.totalorder %s1289_s18, 0  ;;  %p822_p3 = scmp.ge.s32.totalorder %s1230_s17, 1 }
   0xa   : > { %p154_p4 = scmp.lt.s32.totalorder %s1230_s17, 7  ;;  %s1232_s22 = smov [#allocation8]  }
   0xb   : > { %p1300_p5 = por %p1560_p2, %p61_p1  ;;  %s170_s23 = sshll.u32 %s1232_s22, 4  ;;  %s171_s23 = int_to_ptr.vmem [resolvable:$true] %s170_s23 }
   0xc   : > { %p1304_p6 = pnand %p822_p3, %p154_p4  ;;  %p56_p8 = scmp.eq.s32.totalorder %s1230_s17, 0 }
   0xd   : > { %s1563_s20 = scalar_select %p1300_p5, 1, 0 }
   0xe   : > { %s1564_s21 = scalar_select %p1304_p6, 1, 0 }
   0xf   : > { %p909_p7 = pneg %p1304_p6  ;;  %s32_s25 = sadd.s32 1, %s1226_s16 }
  0x10   : > { %p1318_p10 = scmp.ge.s32.totalorder %s32_s25, 6  ;;  %p1325_p11 = por %p56_p8, %p55_p0 }
  0x11   : > { %p1313_p9 = pnand %p909_p7, %p1560_p2  ;;  %s1054_s30 = scalar_lea.hbm %s1558_s2, 32 }
  0x12   : > { %s1566_s26 = scalar_select %p1318_p10, 1, 0 }
  0x13   : > { %s1567_s27 = scalar_select %p1325_p11, 1, 0 }
  0x14   : > { %p1055_p13 = scmp.ne.s32.totalorder %s1558_s2, %s1054_s30  ;;  %p1056_p1 = pneg %p1313_p9 }
  0x15   : > { %p1061_p0 = scmp.lt.u32.totalorder %s1054_s30, %s1558_s2 }
  0x16   : > { %p1057_p3 = pnand %p1056_p1, %p1055_p13 }
  0x18   : > { %p1058_p4 = pneg %p1057_p3 }
  0x1a   : > { %p1063_p7 = pnand %p1061_p0, %p1058_p4 }
  0x1c   : > { %1066 = shalt.err (!%p1063_p7)
}
  0x1d   : > { %s1067_s8 = scalar_lea.vmem %s171_s23, 32  ;;  %p1075_p5 = scmp.lt.s32.totalorder %s171_s23, %s171_s23 }
  0x1e   : > { %p1068_p8 = scmp.ne.s32.totalorder %s171_s23, %s1067_s8  ;;  %p1076_p6 = scmp.lt.s32.totalorder %s1067_s8, %s1067_s8 }
  0x20   : > { %p1070_p2 = pnand %p1068_p8, %p1056_p1  ;;  %p1077_p11 = por %p1076_p6, %p1075_p5 }
  0x22   : > { %p1071_p12 = pneg %p1070_p2 }
  0x24   : > { %p1078_p10 = pnand %p1077_p11, %p1071_p12 }
  0x26   : > { %1081 = shalt.err (!%p1078_p10)
}
  0x27   : > { %912 = dma.hbm_to_vmem [thread:$0]  (!%p1313_p9), %s1558_s2, 32, %s171_s23, [#allocation7]  }
  0x28   : > { %p1568_p2 = scmp.ne.s32.totalorder %s1566_s26, 0  ;;  %s1351_s11 = sand.u32 1, %s1218_s14  }
  0x29   : > { %s888_s12 = smul.u32 192, %s1226_s16  ;;  %p1569_p6 = scmp.ne.s32.totalorder %s1567_s27, 0 }
  0x2a   : > { %s1582_s25 = smov (%p1568_p2, %s32_s25), 0  ;;  %s893_s24 = smul.u32 12, %s1351_s11 }
  0x2b   : > { %s44_s22 = ssub.s32 %s1226_s16, %s1582_s25  ;;  %s1360_s30 = scalar_lea.hbm %s1556_s0, %s888_s12 }
  0x2c   : > { %p46_p5 = scmp.eq.s32.totalorder %s44_s22, 0  ;;  %p1570_p9 = scmp.lt.s32.totalorder %s1230_s17, 6 }
  0x2d   : > { %s185_s4 = scalar_lea.vmem [#allocation3], %s893_s24  ;;  %s894_s6 = smul.u32 384, %s1351_s11 }
  0x2e   : > { %p1366_p10 = pnand %p1570_p9, %p1569_p6  ;;  %s195_s5 = sshll.u32 %s185_s4, 4  ;;  %s1376_s5 = int_to_ptr.vmem [resolvable:$true] %s195_s5 }
  0x2f   : > { %s1373_s26 = scalar_select %p46_p5, %s1218_s14, %s48_s19  }
  0x30   : > { %s892_s27 = smul.u32 6144, %s1226_s16  ;;  %s182_s7 = scalar_lea.sflag [#allocation4], %s1351_s11 }
  0x31   : > { %s1082_s8 = scalar_lea.hbm %s1360_s30, 192  ;;  %p1084_p12 = pneg %p1366_p10 }
  0x32   : > { %p1083_p11 = scmp.ne.s32.totalorder %s1360_s30, %s1082_s8  ;;  %s1087_s19 = scalar_lea.hbm %s1556_s0, 1152 }
  0x33   : > { %p1088_p3 = scmp.lt.u32.totalorder %s1360_s30, %s1556_s0  ;;  %p1089_p4 = scmp.lt.u32.totalorder %s1087_s19, %s1082_s8 }
  0x34   : > { %p1085_p13 = pnand %p1084_p12, %p1083_p11  ;;  %p1091_p7 = scmp.lt.u32.totalorder %s1082_s8, %s1360_s30 }
  0x35   : > { %p1090_p0 = por %p1089_p4, %p1088_p3 }
  0x36   : > { %p1086_p1 = pneg %p1085_p13 }
  0x37   : > { %p1092_p8 = por %p1091_p7, %p1090_p0 }
  0x39   : > { %p1093_p2 = pnand %p1092_p8, %p1086_p1 }
  0x3b   : > { %1096 = shalt.err (!%p1093_p2)
}
  0x3c   : > { %s1097_s24 = scalar_lea.vmem %s1376_s5, 192  ;;  %s1233_s28 = smov [#allocation3]  }
  0x3d   : > { %p1098_p5 = scmp.ne.s32.totalorder %s1376_s5, %s1097_s24  ;;  %s1102_s29 = sshll.u32 %s1233_s28, 4  ;;  %s1103_s29 = int_to_ptr.vmem [resolvable:$false] %s1102_s29 }
  0x3e   : > { %s1104_s4 = scalar_lea.vmem %s1103_s29, 384  ;;  %p1105_p11 = scmp.lt.s32.totalorder %s1376_s5, %s1103_s29 }
  0x3f   : > { %p1100_p6 = pnand %p1098_p5, %p1084_p12  ;;  %p1106_p13 = scmp.lt.s32.totalorder %s1104_s4, %s1097_s24 }
  0x41   : > { %p1101_p9 = pneg %p1100_p6  ;;  %p1107_p3 = por %p1106_p13, %p1105_p11 }
  0x43   : > { %p1108_p4 = pnand %p1107_p3, %p1101_p9 }
  0x45   : > { %1111 = shalt.err (!%p1108_p4)
}
  0x46   : > { %916 = dma.hbm_to_vmem [thread:$0]  (!%p1366_p10), %s1360_s30, 192, %s1376_s5, %s182_s7  }
  0x47   : > { %s202_s8 = sand.u32 1, %s1230_s17   ;;  %s206_s9 = scalar_lea.vmem [#allocation6], %s894_s6 }
  0x48   : > { %s216_s10 = sshll.u32 %s206_s9, 4  ;;  %s1415_s22 = scalar_lea.hbm %s1557_s1, %s892_s27  ;;  %s1408_s10 = int_to_ptr.vmem [resolvable:$true] %s216_s10 }
  0x49   : > { %s1417_s24 = scalar_lea.sflag [#allocation7], %s202_s8  ;;  %s1112_s28 = scalar_lea.hbm %s1415_s22, 6144 }
  0x4a   : > { %p1113_p1 = scmp.ne.s32.totalorder %s1415_s22, %s1112_s28  ;;  %s1117_s5 = scalar_lea.hbm %s1557_s1, 36864 }
  0x4b   : > { %p1118_p8 = scmp.lt.u32.totalorder %s1415_s22, %s1557_s1  ;;  %p1119_p2 = scmp.lt.u32.totalorder %s1117_s5, %s1112_s28 }
  0x4c   : > { %p1115_p0 = pnand %p1113_p1, %p1084_p12  ;;  %p1121_p6 = scmp.lt.u32.totalorder %s1112_s28, %s1415_s22 }
  0x4d   : > { %p1120_p5 = por %p1119_p2, %p1118_p8 }
  0x4e   : > { %p1116_p7 = pneg %p1115_p0 }
  0x4f   : > { %p1122_p9 = por %p1121_p6, %p1120_p5 }
  0x51   : > { %p1123_p11 = pnand %p1122_p9, %p1116_p7 }
  0x53   : > { %1126 = shalt.err (!%p1123_p11)
}
  0x54   : > { %s1127_s27 = scalar_lea.vmem %s1408_s10, 6144  ;;  %s1234_s29 = smov [#allocation6]  }
  0x55   : > { %p1128_p13 = scmp.ne.s32.totalorder %s1408_s10, %s1127_s27  ;;  %s1132_s4 = sshll.u32 %s1234_s29, 4  ;;  %s1133_s4 = int_to_ptr.vmem [resolvable:$false] %s1132_s4 }
  0x56   : > { %s1134_s8 = scalar_lea.vmem %s1133_s4, 12288  ;;  %p1135_p1 = scmp.lt.s32.totalorder %s1408_s10, %s1133_s4 }
  0x57   : > { %p1130_p3 = pnand %p1128_p13, %p1084_p12  ;;  %p1136_p0 = scmp.lt.s32.totalorder %s1134_s8, %s1127_s27 }
  0x59   : > { %p1131_p4 = pneg %p1130_p3  ;;  %p1137_p8 = por %p1136_p0, %p1135_p1 }
  0x5b   : > { %p1138_p2 = pnand %p1137_p8, %p1131_p4 }
  0x5d   : > { %1141 = shalt.err (!%p1138_p2)
}
  0x5e   : > { %s1235_s9 = smov 128   ;;  %s1236_s19 = smov 8  }
  0x5f   : > { %919 = dma.hbm_to_vmem [thread:$0]  (!%p1366_p10), %s1415_s22, 6144, %s1408_s10, %s1417_s24, %s1235_s9, %s1235_s9, %s1236_s19  }
  0x60   : > { %p1572_p12 = scmp.ne.s32.totalorder %s1564_s21, 0 }
  0x61   : > { %s230_s12 = sand.u32 (!%p1572_p12), 1, %s1214_s13   ;;  %p1573_p7 = scmp.ne.s32.totalorder (!%p1572_p12), %s1563_s20, 0 }
  0x62   : > { %228 = sbr.rel (%p1572_p12) target bundleno = 444 (0x1bc), region = 32  ;;  %s231_s11 = scalar_lea.sflag (!%p1572_p12), [#allocation4], %s230_s12 }
  0x63   : > { %s895_s28 = smul.u32 (!%p1572_p12), 12, %s230_s12 }
  0x65   : > { %s1446_s30 = scalar_lea.vmem (!%p1572_p12), [#allocation3], %s895_s28 }
  0x69   : > { %1193 = dma.done.wait (%p1573_p7), %s231_s11, 192  }
  0x6a   : > { %1195 = vsyncadd (%p1573_p7), %s231_s11, 4294967104  ;;  %s239_s5 = sand.u32 1, %s1289_s18   ;;  %s896_s23 = smul.u32 384, %s230_s12 }
  0x6b   : > { %s240_s10 = scalar_lea.sflag [#allocation7], %s239_s5 }
  0x6c   : > { %s1453_s22 = scalar_lea.vmem [#allocation6], %s896_s23 }
  0x6d   : > { %1197 = dma.done.wait (%p1573_p7), %s240_s10, 6144  }
  0x6e   : > { %1199 = vsyncadd (%p1573_p7), %s240_s10, 4294961152  ;;  %p1574_p10 = scmp.eq.s32.totalorder %s1289_s18, 0 }
  0x70   : > { %1201 = dma.done.wait (%p1574_p10), [#allocation7], 32   ;;  %p1575_p5 = pmov %p1574_p10 }
  0x71   : > { %p830_p6 = scmp.ne.s32.totalorder %s1222_s15, 0 }
  0x72   : > { %1203 = vsyncadd (%p1575_p5), [#allocation7], 4294967264  ;;  %v1237_v0 = vmov (!%p830_p6), 0.0  }
  0x73   : > { %279 = sbr.rel (%p830_p6) target bundleno = 122 (0x7a), region = 48  ;;  %280 = vst [vmem:[#allocation2] sm:$0xff] (!%p830_p6), %v1237_v0  ;;  %281 = vst [vmem:[#allocation2 + $0x8] sm:$0xff] (!%p830_p6), %v1237_v0 }
  0x7a PF: > { %v979_v1 = vld [vmem:[%s1453_s22 + $0x4] ss:$8 sps:$4 sm:$0xff]   ;;  %v981_v2 = vld [vmem:[%s1453_s22] ss:$8 sps:$4 sm:$0xff]   ;;  %v1238_v3 = vmov 0   ;;  %v282_v58 = vld [vmem:[#allocation2] sm:$0xff] }
  0x7b   : > { %658 = vmatprep.mubr.bf16.mxu1 %v1238_v3  ;;  %585 = vmatprep.subr.bf16.mxu0 %v979_v1  ;;  %v982_v4 = vld [vmem:[%s1453_s22 + $0x14] ss:$8 sps:$4 sm:$0xff]   ;;  %v984_v5 = vld [vmem:[%s1453_s22 + $0x10] ss:$8 sps:$4 sm:$0xff]   ;;  %v985_v6 = vld [vmem:[%s1453_s22 + $0x24] ss:$8 sps:$4 sm:$0xff]  }
  0x7c   : > { %586 = vmatpush1.bf16.msra.mxu0 %v981_v2  ;;  %v987_v7 = vld [vmem:[%s1453_s22 + $0x20] ss:$8 sps:$4 sm:$0xff]   ;;  %v988_v8 = vld [vmem:[%s1453_s22 + $0x34] ss:$8 sps:$4 sm:$0xff]   ;;  %v990_v9 = vld [vmem:[%s1453_s22 + $0x30] ss:$8 sps:$4 sm:$0xff]  }
  0x7d   : > { %587 = vmatprep.subr.bf16.mxu0 %v982_v4  ;;  %v1003_v10 = vld [vmem:[%s1453_s22 + $0x104] ss:$8 sps:$4 sm:$0xff]   ;;  %v1005_v11 = vld [vmem:[%s1453_s22 + $0x100] ss:$8 sps:$4 sm:$0xff]   ;;  %v1009_v13 = vld [vmem:[%s1453_s22 + $0x114] ss:$8 sps:$4 sm:$0xff]  }
  0x7e   : > { %v991_v12 = vld [vmem:[%s1453_s22 + $0x44] ss:$8 sps:$4 sm:$0xff]   ;;  %626 = vmatprep.subr.bf16.mxu1 %v1003_v10  ;;  %v1011_v14 = vld [vmem:[%s1453_s22 + $0x110] ss:$8 sps:$4 sm:$0xff]   ;;  %v993_v15 = vld [vmem:[%s1453_s22 + $0x40] ss:$8 sps:$4 sm:$0xff]  }
  0x7f   : > { %627 = vmatpush1.bf16.msra.mxu1 %v1005_v11  ;;  %v994_v16 = vld [vmem:[%s1453_s22 + $0x54] ss:$8 sps:$4 sm:$0xff]   ;;  %v1015_v17 = vld [vmem:[%s1453_s22 + $0x124] ss:$8 sps:$4 sm:$0xff]   ;;  %v1017_v18 = vld [vmem:[%s1453_s22 + $0x120] ss:$8 sps:$4 sm:$0xff]  }
  0x80   : > { %588 = vmatpush1.bf16.msra.mxu0 %v984_v5  ;;  %628 = vmatprep.subr.bf16.mxu1 %v1009_v13  ;;  %v996_v19 = vld [vmem:[%s1453_s22 + $0x50] ss:$8 sps:$4 sm:$0xff]   ;;  %v1021_v20 = vld [vmem:[%s1453_s22 + $0x134] ss:$8 sps:$4 sm:$0xff]   ;;  %v997_v21 = vld [vmem:[%s1453_s22 + $0x64] ss:$8 sps:$4 sm:$0xff]  }
  0x81   : > { %589 = vmatprep.subr.bf16.mxu0 %v985_v6  ;;  %v1023_v22 = vld [vmem:[%s1453_s22 + $0x130] ss:$8 sps:$4 sm:$0xff]   ;;  %v999_v23 = vld [vmem:[%s1453_s22 + $0x60] ss:$8 sps:$4 sm:$0xff]   ;;  %v1027_v24 = vld [vmem:[%s1453_s22 + $0x144] ss:$8 sps:$4 sm:$0xff]  }
  0x82   : > { %v1000_v25 = vld [vmem:[%s1453_s22 + $0x74] ss:$8 sps:$4 sm:$0xff]   ;;  %v1029_v26 = vld [vmem:[%s1453_s22 + $0x140] ss:$8 sps:$4 sm:$0xff]   ;;  %v1002_v27 = vld [vmem:[%s1453_s22 + $0x70] ss:$8 sps:$4 sm:$0xff]  }
  0x83   : > { %629 = vmatpush1.bf16.msra.mxu1 %v1011_v14  ;;  %v1033_v28 = vld [vmem:[%s1453_s22 + $0x154] ss:$8 sps:$4 sm:$0xff]   ;;  %v1006_v29 = vld [vmem:[%s1453_s22 + $0x84] ss:$8 sps:$4 sm:$0xff]   ;;  %v1035_v30 = vld [vmem:[%s1453_s22 + $0x150] ss:$8 sps:$4 sm:$0xff]  }
  0x84   : > { %590 = vmatpush1.bf16.msra.mxu0 %v987_v7  ;;  %630 = vmatprep.subr.bf16.mxu1 %v1015_v17  ;;  %v1008_v31 = vld [vmem:[%s1453_s22 + $0x80] ss:$8 sps:$4 sm:$0xff]   ;;  %v1039_v32 = vld [vmem:[%s1453_s22 + $0x164] ss:$8 sps:$4 sm:$0xff]   ;;  %v1012_v33 = vld [vmem:[%s1453_s22 + $0x94] ss:$8 sps:$4 sm:$0xff]  }
  0x85   : > { %591 = vmatprep.subr.bf16.mxu0 %v988_v8  ;;  %v284_v34 = vld [vmem:[%s1446_s30] sm:$0xff]  ;;  %v1051_v43 = vld [vmem:[%s1446_s30 + $0x8] ss:$0 sps:$4 sm:$0xff]   ;;  %v283_v61 = vld [vmem:[#allocation2 + $0x8] sm:$0xff]  ;;  %p882_p9 = scmp.ne.s32.totalorder %s1222_s15, 5 }
  0x86   : > { %v832_v35 = vcombine.high %v284_v34, %v284_v34  ;;  %v1041_v36 = vld [vmem:[%s1453_s22 + $0x160] ss:$8 sps:$4 sm:$0xff]   ;;  %v1014_v37 = vld [vmem:[%s1453_s22 + $0x90] ss:$8 sps:$4 sm:$0xff]   ;;  %v1045_v38 = vld [vmem:[%s1453_s22 + $0x174] ss:$8 sps:$4 sm:$0xff]   ;;  %v831_v53 = vcombine.low %v284_v34, %v284_v34  ;;  %v679_v4 = vlaneseq (!%p882_p9) }
  0x87   : > { %631 = vmatpush1.bf16.msra.mxu1 %v1017_v18  ;;  %v1018_v39 = vld [vmem:[%s1453_s22 + $0xa4] ss:$8 sps:$4 sm:$0xff]   ;;  %v1047_v40 = vld [vmem:[%s1453_s22 + $0x170] ss:$8 sps:$4 sm:$0xff]   ;;  %v1020_v41 = vld [vmem:[%s1453_s22 + $0xa0] ss:$8 sps:$4 sm:$0xff]  }
  0x88   : > { %592 = vmatpush1.bf16.msra.mxu0 %v990_v9  ;;  %632 = vmatprep.subr.bf16.mxu1 %v1021_v20  ;;  %v1024_v42 = vld [vmem:[%s1453_s22 + $0xb4] ss:$8 sps:$4 sm:$0xff]   ;;  %v1026_v44 = vld [vmem:[%s1453_s22 + $0xb0] ss:$8 sps:$4 sm:$0xff]   ;;  %v1030_v45 = vld [vmem:[%s1453_s22 + $0xc4] ss:$8 sps:$4 sm:$0xff]  }
  0x89   : > { %593 = vmatprep.subr.bf16.mxu0 %v991_v12  ;;  %617 = vmatprep.mubr.bf16.mxu0 %v832_v35  ;;  %v1032_v46 = vld [vmem:[%s1453_s22 + $0xc0] ss:$8 sps:$4 sm:$0xff]   ;;  %v1036_v47 = vld [vmem:[%s1453_s22 + $0xd4] ss:$8 sps:$4 sm:$0xff]   ;;  %v1038_v48 = vld [vmem:[%s1453_s22 + $0xd0] ss:$8 sps:$4 sm:$0xff]  }
  0x8a   : > { %v1042_v49 = vld [vmem:[%s1453_s22 + $0xe4] ss:$8 sps:$4 sm:$0xff]   ;;  %v1044_v50 = vld [vmem:[%s1453_s22 + $0xe0] ss:$8 sps:$4 sm:$0xff]   ;;  %v1048_v51 = vld [vmem:[%s1453_s22 + $0xf4] ss:$8 sps:$4 sm:$0xff]  }
  0x8b   : > { %633 = vmatpush1.bf16.msra.mxu1 %v1023_v22  ;;  %v1050_v52 = vld [vmem:[%s1453_s22 + $0xf0] ss:$8 sps:$4 sm:$0xff]   ;;  %v680_v5 = vshrl.u32 (!%p882_p9), %v679_v4, 7  ;;  %v677_v6 = vld [vmem:[#allocation8] sm:$0x3] (!%p882_p9) }
  0x8c   : > { %594 = vmatpush1.bf16.msra.mxu0 %v993_v15  ;;  %634 = vmatprep.subr.bf16.mxu1 %v1027_v24 }
  0x8d   : > { %595 = vmatprep.subr.bf16.mxu0 %v994_v16  ;;  %v681_v7 = vsub.s32 (!%p882_p9), 0, %v680_v5  ;;  %v685_v8 = vsub.s32 (!%p882_p9), 1, %v680_v5 }
  0x8f   : > { %635 = vmatpush1.bf16.msra.mxu1 %v1029_v26  ;;  %v682_v11 = vrot.slane (!%p882_p9), %v677_v6, %v681_v7  ;;  %v686_v12 = vrot.slane (!%p882_p9), %v677_v6, %v685_v8 }
  0x90   : > { %596 = vmatpush1.bf16.msra.mxu0 %v996_v19  ;;  %636 = vmatprep.subr.bf16.mxu1 %v1033_v28 }
  0x91   : > { %597 = vmatprep.subr.bf16.mxu0 %v997_v21 }
  0x93   : > { %637 = vmatpush1.bf16.msra.mxu1 %v1035_v30 }
  0x94   : > { %598 = vmatpush1.bf16.msra.mxu0 %v999_v23  ;;  %638 = vmatprep.subr.bf16.mxu1 %v1039_v32 }
  0x95   : > { %599 = vmatprep.subr.bf16.mxu0 %v1000_v25 }
  0x97   : > { %639 = vmatpush1.bf16.msra.mxu1 %v1041_v36 }
  0x98   : > { %600 = vmatpush1.bf16.msra.mxu0 %v1002_v27  ;;  %640 = vmatprep.subr.bf16.mxu1 %v1045_v38 }
  0x99   : > { %601 = vmatprep.subr.bf16.mxu0 %v1006_v29 }
  0x9b   : > { %641 = vmatpush1.bf16.msra.mxu1 %v1047_v40 }
  0x9c   : > { %602 = vmatpush1.bf16.msra.mxu0 %v1008_v31 }
  0x9d   : > { %603 = vmatprep.subr.bf16.mxu0 %v1012_v33 }
  0x9e   : > { %659 = vmatmul.mubr.bf16.vlgmr.msra.gmra.mrb[0].mxu1 %v1051_v43 }
  0xa0   : > { %604 = vmatpush1.bf16.msra.mxu0 %v1014_v37 }
  0xa1   : > { %605 = vmatprep.subr.bf16.mxu0 %v1018_v39 }
  0xa4   : > { %606 = vmatpush1.bf16.msra.mxu0 %v1020_v41 }
  0xa5   : > { %607 = vmatprep.subr.bf16.mxu0 %v1024_v42 }
  0xa8   : > { %608 = vmatpush1.bf16.msra.mxu0 %v1026_v44 }
  0xa9   : > { %609 = vmatprep.subr.bf16.mxu0 %v1030_v45 }
  0xac   : > { %610 = vmatpush1.bf16.msra.mxu0 %v1032_v46 }
  0xad   : > { %611 = vmatprep.subr.bf16.mxu0 %v1036_v47 }
  0xb0   : > { %612 = vmatpush1.bf16.msra.mxu0 %v1038_v48 }
  0xb1   : > { %613 = vmatprep.subr.bf16.mxu0 %v1042_v49 }
  0xb4   : > { %614 = vmatpush1.bf16.msra.mxu0 %v1044_v50 }
  0xb5   : > { %615 = vmatprep.subr.bf16.mxu0 %v1048_v51 }
  0xb8   : > { %616 = vmatpush1.bf16.msra.mxu0 %v1050_v52 }
  0xbb   : > { %618 = vmatmul.mubr.bf16.vlgmr.msra.gmra.mrb[0].mxu0 %v831_v53 }
 0x171   : > { %v660_v54 = vpop.f32.mrb[0].mxu1 }
 0x172   : > { %v662_v55 = vpop.f32.mrb[1].mxu1 }
 0x173   : > { %v664_v56 = vpop.f32.mrb[2].mxu1 }
 0x174   : > { %v665_v57 = vpop.f32.mrb[3].mxu1 }
 0x18e   : > { %v619_v59 = vpop.f32.mrb[0].mxu0  ;;  %674 = sbr.rel (%p882_p9) target bundleno = 419 (0x1a3), region = 52 }
 0x18f   : > { %v661_v60 = vadd.f32 %v660_v54, %v619_v59  ;;  %v621_v62 = vpop.f32.mrb[1].mxu0 }
 0x190   : > { %v663_v63 = vadd.f32 %v662_v55, %v621_v62  ;;  %v623_v0 = vpop.f32.mrb[2].mxu0 }
 0x191   : > { %v667_v1 = vadd.f32 %v661_v60, %v282_v58  ;;  %v624_v2 = vpop.f32.mrb[3].mxu0 }
 0x192   : > { %v668_v3 = vadd.f32 %v663_v63, %v283_v61 }
 0x193   : > { %669 = vst [vmem:[#allocation2] sm:$0xff] %v667_v1 }
 0x194   : > { %670 = vst [vmem:[#allocation2 + $0x8] sm:$0xff] %v668_v3 }
 0x19a   : > { %v675_v9 = vld [vmem:[#allocation2] sm:$0xff] }
 0x19b   : > { %v676_v10 = vld [vmem:[#allocation2 + $0x8] sm:$0xff]  ;;  %v689_v13 = vadd.f32 %v682_v11, %v675_v9 }
 0x19c   : > { %v690_v14 = vadd.f32 %v686_v12, %v676_v10 }
 0x19d   : > { %v691_v15 = vmax.f32 %v689_v13, 0.0 }
 0x19e   : > { %v692_v16 = vmax.f32 %v690_v14, 0.0 }
 0x1a0   : > { %v891_v17 = vpack.c.bf16 %v692_v16, %v691_v15 }
 0x1a2   : > { %701 = vst [vmem:[#allocation9] sm:$0xff] %v891_v17 }
 0x1a3 PF: > { %p923_p11 = scmp.eq.s32.totalorder %s1289_s18, 5  ;;  %s1239_s15 = smov [#allocation9]  }
 0x1a4   : > { %s714_s20 = sshll.u32 %s1239_s15, 4  ;;  %s715_s20 = int_to_ptr.vmem [resolvable:$true] %s714_s20 }
 0x1a5   : > { %s1142_s21 = scalar_lea.vmem %s715_s20, 128  ;;  %p1149_p1 = scmp.lt.s32.totalorder %s715_s20, %s715_s20 }
 0x1a6   : > { %p1143_p13 = scmp.ne.s32.totalorder %s715_s20, %s1142_s21  ;;  %p1150_p0 = scmp.lt.s32.totalorder %s1142_s21, %s1142_s21 }
 0x1a8   : > { %p1144_p3 = pnand %p1143_p13, %p923_p11  ;;  %p1151_p8 = por %p1150_p0, %p1149_p1 }
 0x1aa   : > { %p1145_p4 = pneg %p1144_p3 }
 0x1ac   : > { %p1152_p2 = pnand %p1151_p8, %p1145_p4 }
 0x1ae   : > { %1155 = shalt.err (!%p1152_p2)
}
 0x1af   : > { %s1156_s7 = scalar_lea.hbm %s1559_s3, 128 }
 0x1b0   : > { %p1157_p12 = scmp.ne.s32.totalorder %s1559_s3, %s1156_s7  ;;  %p1162_p5 = scmp.lt.u32.totalorder %s1156_s7, %s1559_s3 }
 0x1b2   : > { %p1158_p7 = pnand %p1157_p12, %p923_p11 }
 0x1b4   : > { %p1159_p10 = pneg %p1158_p7 }
 0x1b6   : > { %p1164_p6 = pnand %p1162_p5, %p1159_p10 }
 0x1b8   : > { %1167 = shalt.err (!%p1164_p6)
}
 0x1b9   : > { %906 = dma.vmem_to_hbm [thread:$0]  (%p923_p11), %s715_s20, 128, %s1559_s3, [#allocation5]  }
 0x1ba   : > { %1205 = dma.done.wait (%p923_p11), [#allocation5], 128  }
 0x1bb   : > { %1207 = vsyncadd (%p923_p11), [#allocation5], 4294967168 }
 0x1bc PF: > { %s20_s17 = sadd.s32 1, %s1230_s17   ;;  %s1576_s12 = smov %s1214_s13 }
 0x1bd   : > { %p17_p9 = scmp.ge.s32.totalorder %s20_s17, 8   ;;  %s1577_s13 = smov %s1218_s14 }
 0x1be   : > { %s1578_s14 = smov %s1373_s26  ;;  %s1579_s15 = smov %s1226_s16 }
 0x1bf   : > { %s1580_s16 = smov %s1582_s25  ;;  %19 = sbr.rel (!%p17_p9) target bundleno = 7 (0x7), region = 96 }
 0x1c6   :  { %727 = vsyncpa [#allocation4], 1 }
 0x1c7   :  { %729 = vsyncpa [#allocation4 + $0x1], 1 }
 0x1c8   :  { %730 = vsyncpa [#allocation7], 1 }
 0x1c9   :  { %732 = vsyncpa [#allocation7 + $0x1], 1 }
 0x1ca   :  { %733 = vsyncpa [#allocation5], 1 }
 0x1cb   :  { %735 = vsyncpa [#allocation5 + $0x1], 1 }

</bundles_post_ra>
